<compile_context>
chip_gen: v5e
topology: v5e:2x2
jax: 0.10.0
libtpu: 0.0.40
codegen_flags: <defaults>
</compile_context>

<pallas_src>
import functools

import jax
import jax.numpy as jnp
from jax import lax
from jax.experimental import pallas as pl
from jax.experimental.pallas import tpu as pltpu


def _conv_stats_kernel(x_ref, w_ref, y_ref, sum_ref, ssq_ref, *,
                       bblk, kh, kw, stride, ho, wo, cin, cout_p):
    """x_ref:[B,Hp,Wp,Cin] bf16   w_ref:[kh*kw*cin, cout_p] bf16
    y_ref:[B,ho,wo,cout_p] f32    sum_ref/ssq_ref:[1,1,cout_p] f32 (per-block partials)."""
    x = x_ref[...]                                            # [B, Hp, Wp, Cin] bf16
    m = bblk * ho * wo
    cols = []
    for ikh in range(kh):
        for ikw in range(kw):
            if stride == 1:
                tap = x[:, ikh:ikh + ho, ikw:ikw + wo, :]     # [B, ho, wo, cin]
            else:
                # TODO(synk): stride>1 conv tap uses a strided slice (untested path;
                # the demo exercises stride==1 only).
                tap = x[:, ikh:ikh + stride * (ho - 1) + 1:stride,
                        ikw:ikw + stride * (wo - 1) + 1:stride, :]
            cols.append(tap.reshape(m, cin))
    col = jnp.concatenate(cols, axis=-1)                      # [M, kh*kw*cin] bf16
    # Single MXU matmul, bf16 operands, f32 accumulation.
    y = jnp.dot(col, w_ref[...], preferred_element_type=jnp.float32)   # [M, cout_p]
    # NOTE: conv bias intentionally omitted -- a per-channel constant cancels exactly
    # under training-mode BatchNorm (batch mean absorbs it, variance is unchanged).
    y_ref[...] = y.reshape(bblk, ho, wo, cout_p)
    # Per-block partial BN statistics (combined on the host side).
    sum_ref[0] = jnp.sum(y, axis=0, keepdims=True)
    ssq_ref[0] = jnp.sum(y * y, axis=0, keepdims=True)


def _bn_act_pool_kernel(y_ref, scale_ref, shift_ref, selw_ref, o_ref, *,
                        bblk, ho, wo, cout_p, pool_k, pool_s, hout, wout,
                        activ_type, pool_type):
    """y_ref:[B,ho,wo,cout_p] f32   scale/shift:[1,cout_p]   selw:[wout, wo-k+1] 0/1
    o_ref:[B,hout,wout,cout_p] f32."""
    z = y_ref[...] * scale_ref[...] + shift_ref[...]          # fused BN affine
    if activ_type == "relu":
        z = jnp.maximum(z, 0.0)
    else:  # exact erf-GELU (nn.GELU default).  TODO(synk): tanh-approx would use the
        # otherwise-idle EUP slot; kept exact for bit-for-bit parity with nn.GELU.
        z = 0.5 * z * (1.0 + lax.erf(z * jnp.float32(0.7071067811865476)))

    comb = jnp.maximum if pool_type == "max" else jnp.add

    # ---- H direction: window combine + stride decimation on a LEADING dim (free) ----
    if pool_s == pool_k and ho == hout * pool_k:
        zg = z.reshape(bblk, hout, pool_k, wo, cout_p)        # leading-dim split only
        hdec = zg[:, :, 0]
        for ph in range(1, pool_k):
            hdec = comb(hdec, zg[:, :, ph])
    else:
        hs = ho - pool_k + 1
        hwin = z[:, 0:hs]
        for ph in range(1, pool_k):
            hwin = comb(hwin, z[:, ph:ph + hs])
        hdec = jnp.concatenate(
            [hwin[:, oh * pool_s:oh * pool_s + 1] for oh in range(hout)], axis=1)
    # hdec: [B, hout, wo, cout_p]

    # ---- W direction: window combine via unit-stride sublane slices, stride
    # decimation as ONE tiny batched 0/1 selection matmul (linear in spatial size;
    # replaces the old quadratic [hout*wout, ho*wo] sel matmul). ----
    ws = wo - pool_k + 1
    wwin = hdec[:, :, 0:ws]
    for pw in range(1, pool_k):
        wwin = comb(wwin, hdec[:, :, pw:pw + ws])
    wflat = wwin.reshape(bblk * hout, ws, cout_p)             # leading-dim merge
    selb = jnp.broadcast_to(selw_ref[...], (bblk * hout, wout, ws))
    pooled = jnp.einsum("rvw,rwc->rvc", selb, wflat,
                        preferred_element_type=jnp.float32)   # [B*hout, wout, cout_p]
    o_ref[...] = pooled.reshape(bblk, hout, wout, cout_p).astype(o_ref.dtype)


def conv_unit_forward(x_nchw, w_oihw, bias, gamma, beta, *, stride, padding,
                      pool_type, pool_kernel_size, pool_stride,
                      activ_type, eps=1e-5):
    # `bias` accepted for nn.Conv2d API parity; it cancels under training-mode BN.
    del bias
    n, cin, h, w = x_nchw.shape
    cout, cin_w, kh, kw = w_oihw.shape
    assert cin == cin_w
    ho = (h + 2 * padding - kh) // stride + 1
    wo = (w + 2 * padding - kw) // stride + 1
    pk, ps = pool_kernel_size, pool_stride
    hout = (ho - pk) // ps + 1
    wout = (wo - pk) // ps + 1
    hp, wp = h + 2 * padding, w + 2 * padding
    cout_p = ((cout + 127) // 128) * 128        # lane-dense channel padding
    kkc = kh * kw * cin

    # Batch blocking: fold images until each grid step has >=256 im2col rows.
    bblk = max(1, 256 // max(1, ho * wo))
    bblk = min(bblk, n)
    while n % bblk:
        bblk -= 1
    nb = n // bblk

    # ---- wrapper glue: layouts, padding, bf16 MXU feeds -------------------------
    # TODO(synk): cin=4 still pads to 128 lanes inside VMEM; pre-interleaving x to
    # [N, hp, wp*cin] would densify it but complicates the im2col -- x is tiny here.
    x = jnp.transpose(x_nchw, (0, 2, 3, 1)).astype(jnp.float32)
    x = jnp.pad(x, ((0, 0), (padding, padding), (padding, padding), (0, 0)))
    x = x.astype(jnp.bfloat16)
    w2 = jnp.transpose(w_oihw, (2, 3, 1, 0)).astype(jnp.float32).reshape(kkc, cout)
    w2 = jnp.pad(w2, ((0, 0), (0, cout_p - cout))).astype(jnp.bfloat16)
    g = jnp.pad(gamma.astype(jnp.float32), (0, cout_p - cout)).reshape(1, cout_p)
    be = jnp.pad(beta.astype(jnp.float32), (0, cout_p - cout)).reshape(1, cout_p)

    cparams = pltpu.CompilerParams(dimension_semantics=("parallel",),
                                   vmem_limit_bytes=32 * 1024 * 1024)

    # ---- kernel A: conv + partial BN stats ---------------------------------------
    kern_a = functools.partial(
        _conv_stats_kernel, bblk=bblk, kh=kh, kw=kw, stride=stride,
        ho=ho, wo=wo, cin=cin, cout_p=cout_p)
    y, psum, pssq = pl.pallas_call(
        kern_a,
        grid=(nb,),
        in_specs=[
            pl.BlockSpec((bblk, hp, wp, cin), lambda i: (i, 0, 0, 0)),
            pl.BlockSpec((kkc, cout_p), lambda i: (0, 0)),
        ],
        out_specs=(
            pl.BlockSpec((bblk, ho, wo, cout_p), lambda i: (i, 0, 0, 0)),
            pl.BlockSpec((1, 1, cout_p), lambda i: (i, 0, 0)),
            pl.BlockSpec((1, 1, cout_p), lambda i: (i, 0, 0)),
        ),
        out_shape=(
            jax.ShapeDtypeStruct((n, ho, wo, cout_p), jnp.float32),
            jax.ShapeDtypeStruct((nb, 1, cout_p), jnp.float32),
            jax.ShapeDtypeStruct((nb, 1, cout_p), jnp.float32),
        ),
        compiler_params=cparams,
    )(x, w2)

    # ---- tiny per-channel stat math (XLA glue) -----------------------------------
    m_total = float(n * ho * wo)
    s = jnp.sum(psum, axis=0)                    # [1, cout_p]
    sq = jnp.sum(pssq, axis=0)                   # [1, cout_p]
    mean = s / m_total
    # TODO(synk): single-pass E[y^2]-E[y]^2 can cancel for |mean|>>std; f32 partials
    # keep it accurate at these scales.
    var = sq / m_total - mean * mean             # biased (training-mode BN)
    scale = g * lax.rsqrt(var + eps)             # padded channels: gamma=0 -> scale=0
    shift = be - mean * scale

    # 0/1 W-decimation matrix [wout, wo-k+1]; avg pooling folds 1/k^2 here (the kernel
    # accumulates the window sum).
    wsz = wo - pk + 1
    selw = (jnp.arange(wsz)[None, :] ==
            (ps * jnp.arange(wout))[:, None]).astype(jnp.float32)
    if pool_type == "avg":
        selw = selw / float(pk * pk)

    # ---- kernel B: BN apply + activation + pool ----------------------------------
    kern_b = functools.partial(
        _bn_act_pool_kernel, bblk=bblk, ho=ho, wo=wo, cout_p=cout_p,
        pool_k=pk, pool_s=ps, hout=hout, wout=wout,
        activ_type=activ_type, pool_type=pool_type)
    out = pl.pallas_call(
        kern_b,
        grid=(nb,),
        in_specs=[
            pl.BlockSpec((bblk, ho, wo, cout_p), lambda i: (i, 0, 0, 0)),
            pl.BlockSpec((1, cout_p), lambda i: (0, 0)),
            pl.BlockSpec((1, cout_p), lambda i: (0, 0)),
            pl.BlockSpec((wout, wsz), lambda i: (0, 0)),
        ],
        out_specs=pl.BlockSpec((bblk, hout, wout, cout_p), lambda i: (i, 0, 0, 0)),
        out_shape=jax.ShapeDtypeStruct((n, hout, wout, cout_p), jnp.float32),
        compiler_params=cparams,
    )(y, scale, shift, selw)

    out = out[:, :, :, :cout]                    # drop padded channels
    return jnp.transpose(out, (0, 3, 1, 2))      # back to NCHW


def _reference(x_nchw, w_oihw, bias, gamma, beta, *, stride, padding,
               pool_type, pool_kernel_size, pool_stride, activ_type, eps=1e-5):
    """Pure-JAX reference mirroring the PyTorch module (training-mode BN)."""
    y = lax.conv_general_dilated(
        x_nchw, w_oihw, window_strides=(stride, stride),
        padding=[(padding, padding), (padding, padding)],
        dimension_numbers=("NCHW", "OIHW", "NCHW"))
    y = y + bias[None, :, None, None]
    mean = jnp.mean(y, axis=(0, 2, 3), keepdims=True)
    var = jnp.mean((y - mean) ** 2, axis=(0, 2, 3), keepdims=True)
    y = (y - mean) * lax.rsqrt(var + eps) * gamma[None, :, None, None] \
        + beta[None, :, None, None]
    if activ_type == "relu":
        y = jnp.maximum(y, 0.0)
    else:
        y = 0.5 * y * (1.0 + lax.erf(y / jnp.sqrt(2.0)))
    win = (1, 1, pool_kernel_size, pool_kernel_size)
    strd = (1, 1, pool_stride, pool_stride)
    if pool_type == "max":
        y = lax.reduce_window(y, -jnp.inf, lax.max, win, strd, "VALID")
    else:
        y = lax.reduce_window(y, 0.0, lax.add, win, strd, "VALID") \
            / (pool_kernel_size * pool_kernel_size)
    return y


if __name__ == "__main__":
    # ConvUnit(input_channels=4, output_channels=8, kernel_size=3, stride=1,
    #          padding=1, pool_type='max', pool_kernel_size=2, pool_stride=2,
    #          activ_type='relu')
    N, CIN, H, W = 2, 4, 16, 16
    COUT, K, STRIDE, PAD = 8, 3, 1, 1
    POOL_T, POOL_K, POOL_S = "max", 2, 2
    ACTIV = "relu"

    key = jax.random.PRNGKey(0)
    kx, kw_, kb, kg, kbe = jax.random.split(key, 5)
    x = jax.random.normal(kx, (N, CIN, H, W), dtype=jnp.float32)
    w = jax.random.normal(kw_, (COUT, CIN, K, K), dtype=jnp.float32) * 0.1
    b = jax.random.normal(kb, (COUT,), dtype=jnp.float32) * 0.1
    gamma = 1.0 + 0.1 * jax.random.normal(kg, (COUT,), dtype=jnp.float32)
    beta = 0.1 * jax.random.normal(kbe, (COUT,), dtype=jnp.float32)

    out = conv_unit_forward(
        x, w, b, gamma, beta, stride=STRIDE, padding=PAD,
        pool_type=POOL_T, pool_kernel_size=POOL_K, pool_stride=POOL_S,
        activ_type=ACTIV)
    out = jax.block_until_ready(out)

    ref = _reference(
        x, w, b, gamma, beta, stride=STRIDE, padding=PAD,
        pool_type=POOL_T, pool_kernel_size=POOL_K, pool_stride=POOL_S,
        activ_type=ACTIV)

    assert out.shape == (N, COUT, H // POOL_S, W // POOL_S), out.shape
    err = float(jnp.max(jnp.abs(out - ref)))
    assert jnp.allclose(out, ref, atol=1e-2, rtol=1e-2), err
    print("KERNEL_OK")
</pallas_src>

<mosaic_0001>
module attributes {stable_mosaic.version = 11 : i64} {
  func.func @_conv_stats_kernel(%arg0: i32, %arg1: memref<1x18x18x4xbf16, #tpu.memory_space<vmem>>, %arg2: memref<36x128xbf16, #tpu.memory_space<vmem>>, %arg3: memref<1x16x16x128xf32, #tpu.memory_space<vmem>>, %arg4: memref<1x1x128xf32, #tpu.memory_space<vmem>>, %arg5: memref<1x1x128xf32, #tpu.memory_space<vmem>>) attributes {dimension_semantics = [#tpu.dimension_semantics<parallel>], iteration_bounds = array<i64: 2>, scalar_prefetch = 0 : i64, scratch_operands = 0 : i64, tpu.core_type = #tpu.core_type<tc>, window_params = [{transform_indices = @transform_0, window_bounds = array<i64: 1, 18, 18, 4>}, {pipeline_mode = #tpu.pipeline_mode<synchronous>, transform_indices = @transform_1, window_bounds = array<i64: 36, 128>}, {transform_indices = @transform_2, window_bounds = array<i64: 1, 16, 16, 128>}, {transform_indices = @transform_3, window_bounds = array<i64: 1, 1, 128>}, {transform_indices = @transform_4, window_bounds = array<i64: 1, 1, 128>}]} {
    %c0 = arith.constant 0 : index
    %c0_0 = arith.constant 0 : index
    %c0_1 = arith.constant 0 : index
    %c0_2 = arith.constant 0 : index
    %0 = vector.load %arg1[%c0, %c0_0, %c0_1, %c0_2] : memref<1x18x18x4xbf16, #tpu.memory_space<vmem>>, vector<1x18x18x4xbf16>
    %1 = vector.extract_strided_slice %0 {offsets = [0, 0, 0, 0], sizes = [1, 16, 16, 4], strides = [1, 1, 1, 1]} : vector<1x18x18x4xbf16> to vector<1x16x16x4xbf16>
    %2 = vector.shape_cast %1 : vector<1x16x16x4xbf16> to vector<256x4xbf16>
    %3 = vector.extract_strided_slice %0 {offsets = [0, 0, 1, 0], sizes = [1, 16, 16, 4], strides = [1, 1, 1, 1]} : vector<1x18x18x4xbf16> to vector<1x16x16x4xbf16>
    %4 = vector.shape_cast %3 : vector<1x16x16x4xbf16> to vector<256x4xbf16>
    %5 = vector.extract_strided_slice %0 {offsets = [0, 0, 2, 0], sizes = [1, 16, 16, 4], strides = [1, 1, 1, 1]} : vector<1x18x18x4xbf16> to vector<1x16x16x4xbf16>
    %6 = vector.shape_cast %5 : vector<1x16x16x4xbf16> to vector<256x4xbf16>
    %7 = vector.extract_strided_slice %0 {offsets = [0, 1, 0, 0], sizes = [1, 16, 16, 4], strides = [1, 1, 1, 1]} : vector<1x18x18x4xbf16> to vector<1x16x16x4xbf16>
    %8 = vector.shape_cast %7 : vector<1x16x16x4xbf16> to vector<256x4xbf16>
    %9 = vector.extract_strided_slice %0 {offsets = [0, 1, 1, 0], sizes = [1, 16, 16, 4], strides = [1, 1, 1, 1]} : vector<1x18x18x4xbf16> to vector<1x16x16x4xbf16>
    %10 = vector.shape_cast %9 : vector<1x16x16x4xbf16> to vector<256x4xbf16>
    %11 = vector.extract_strided_slice %0 {offsets = [0, 1, 2, 0], sizes = [1, 16, 16, 4], strides = [1, 1, 1, 1]} : vector<1x18x18x4xbf16> to vector<1x16x16x4xbf16>
    %12 = vector.shape_cast %11 : vector<1x16x16x4xbf16> to vector<256x4xbf16>
    %13 = vector.extract_strided_slice %0 {offsets = [0, 2, 0, 0], sizes = [1, 16, 16, 4], strides = [1, 1, 1, 1]} : vector<1x18x18x4xbf16> to vector<1x16x16x4xbf16>
    %14 = vector.shape_cast %13 : vector<1x16x16x4xbf16> to vector<256x4xbf16>
    %15 = vector.extract_strided_slice %0 {offsets = [0, 2, 1, 0], sizes = [1, 16, 16, 4], strides = [1, 1, 1, 1]} : vector<1x18x18x4xbf16> to vector<1x16x16x4xbf16>
    %16 = vector.shape_cast %15 : vector<1x16x16x4xbf16> to vector<256x4xbf16>
    %17 = vector.extract_strided_slice %0 {offsets = [0, 2, 2, 0], sizes = [1, 16, 16, 4], strides = [1, 1, 1, 1]} : vector<1x18x18x4xbf16> to vector<1x16x16x4xbf16>
    %18 = vector.shape_cast %17 : vector<1x16x16x4xbf16> to vector<256x4xbf16>
    %19 = tpu.concatenate %2, %4, %6, %8, %10, %12, %14, %16, %18 in 1 : vector<256x4xbf16>, vector<256x4xbf16>, vector<256x4xbf16>, vector<256x4xbf16>, vector<256x4xbf16>, vector<256x4xbf16>, vector<256x4xbf16>, vector<256x4xbf16>, vector<256x4xbf16> -> vector<256x36xbf16>
    %c0_3 = arith.constant 0 : index
    %c0_4 = arith.constant 0 : index
    %20 = vector.load %arg2[%c0_3, %c0_4] : memref<36x128xbf16, #tpu.memory_space<vmem>>, vector<36x128xbf16>
    %cst = arith.constant dense<0.000000e+00> : vector<256x128xf32>
    %21 = tpu.matmul %19, %20, %cst {dimension_numbers = #tpu.dot_dimension_numbers<[1], [0], [0], [1], [0, 0, 1, 1], [], []>} : vector<256x36xbf16>, vector<36x128xbf16>, vector<256x128xf32> -> vector<256x128xf32>
    %22 = vector.shape_cast %21 : vector<256x128xf32> to vector<1x16x16x128xf32>
    %c0_5 = arith.constant 0 : index
    %c0_6 = arith.constant 0 : index
    %c0_7 = arith.constant 0 : index
    %c0_8 = arith.constant 0 : index
    %23 = vector.load %arg3[%c0_5, %c0_6, %c0_7, %c0_8] : memref<1x16x16x128xf32, #tpu.memory_space<vmem>>, vector<1x16x16x128xf32>
    tpu.vector_store %arg3[%c0_5, %c0_6, %c0_7, %c0_8], %22 {strides = array<i32>} : memref<1x16x16x128xf32, #tpu.memory_space<vmem>>, vector<1x16x16x128xf32>,
    %cst_9 = arith.constant dense<0.000000e+00> : vector<128xf32>
    %24 = vector.multi_reduction <add>, %21, %cst_9 [0] : vector<256x128xf32> to vector<128xf32>
    %25 = vector.shape_cast %24 : vector<128xf32> to vector<1x128xf32>
    %c0_10 = arith.constant 0 : index
    %c0_11 = arith.constant 0 : index
    %c0_12 = arith.constant 0 : index
    %26 = vector.load %arg4[%c0_10, %c0_11, %c0_12] : memref<1x1x128xf32, #tpu.memory_space<vmem>>, vector<1x1x128xf32>
    %27 = vector.shape_cast %26 : vector<1x1x128xf32> to vector<1x128xf32>
    %28 = vector.shape_cast %25 : vector<1x128xf32> to vector<1x1x128xf32>
    tpu.vector_store %arg4[%c0_10, %c0_11, %c0_12], %28 {strides = array<i32>} : memref<1x1x128xf32, #tpu.memory_space<vmem>>, vector<1x1x128xf32>,
    %29 = arith.mulf %21, %21 : vector<256x128xf32>
    %cst_13 = arith.constant dense<0.000000e+00> : vector<128xf32>
    %30 = vector.multi_reduction <add>, %29, %cst_13 [0] : vector<256x128xf32> to vector<128xf32>
    %31 = vector.shape_cast %30 : vector<128xf32> to vector<1x128xf32>
    %c0_14 = arith.constant 0 : index
    %c0_15 = arith.constant 0 : index
    %c0_16 = arith.constant 0 : index
    %32 = vector.load %arg5[%c0_14, %c0_15, %c0_16] : memref<1x1x128xf32, #tpu.memory_space<vmem>>, vector<1x1x128xf32>
    %33 = vector.shape_cast %32 : vector<1x1x128xf32> to vector<1x128xf32>
    %34 = vector.shape_cast %31 : vector<1x128xf32> to vector<1x1x128xf32>
    tpu.vector_store %arg5[%c0_14, %c0_15, %c0_16], %34 {strides = array<i32>} : memref<1x1x128xf32, #tpu.memory_space<vmem>>, vector<1x1x128xf32>,
    return
  }
  func.func @transform_0(%arg0: i32) -> (i32, i32, i32, i32) {
    %c0_i32 = arith.constant 0 : i32
    %c0_i32_0 = arith.constant 0 : i32
    %c0_i32_1 = arith.constant 0 : i32
    %c0_i32_2 = arith.constant 0 : i32
    return %arg0, %c0_i32, %c0_i32_0, %c0_i32_1 : i32, i32, i32, i32
  }
  func.func @transform_1(%arg0: i32) -> (i32, i32) {
    %c0_i32 = arith.constant 0 : i32
    %c0_i32_0 = arith.constant 0 : i32
    %c0_i32_1 = arith.constant 0 : i32
    return %c0_i32, %c0_i32_0 : i32, i32
  }
  func.func @transform_2(%arg0: i32) -> (i32, i32, i32, i32) {
    %c0_i32 = arith.constant 0 : i32
    %c0_i32_0 = arith.constant 0 : i32
    %c0_i32_1 = arith.constant 0 : i32
    %c0_i32_2 = arith.constant 0 : i32
    return %arg0, %c0_i32, %c0_i32_0, %c0_i32_1 : i32, i32, i32, i32
  }
  func.func @transform_3(%arg0: i32) -> (i32, i32, i32) {
    %c0_i32 = arith.constant 0 : i32
    %c0_i32_0 = arith.constant 0 : i32
    %c0_i32_1 = arith.constant 0 : i32
    return %arg0, %c0_i32, %c0_i32_0 : i32, i32, i32
  }
  func.func @transform_4(%arg0: i32) -> (i32, i32, i32) {
    %c0_i32 = arith.constant 0 : i32
    %c0_i32_0 = arith.constant 0 : i32
    %c0_i32_1 = arith.constant 0 : i32
    return %arg0, %c0_i32, %c0_i32_0 : i32, i32, i32
  }
}

</mosaic_0001>

<bundles_post_ra>
// kernel: tpu_custom_call.1
= control target key start
LH: loop header
LB: loop body
LE: loop exit
PB: predicated region body
PF: predicated region fallthrough
CT: control target
= control target key end

     0   :  { %10 = vsyncpa [#allocation3], 0  ;;  %s3690_s0 = inlined_call_operand.vmem [shape: bf16[2,18,18,4], index: 0, kind: input, shape index: {}]   ;;  %s3691_s1 = inlined_call_operand.vmem [shape: bf16[36,128], index: 1, kind: input, shape index: {}]   ;;  %s3692_s2 = inlined_call_operand.hbm [shape: f32[2,16,16,128], index: 2, kind: output, shape index: {0}]   ;;  %s3693_s3 = inlined_call_operand.hbm [shape: f32[2,1,128], index: 3, kind: output, shape index: {1}]   ;;  %s3694_s4 = inlined_call_operand.hbm [shape: f32[2,1,128], index: 4, kind: output, shape index: {2}]  }
   0x1   :  { %12 = vsyncpa [#allocation3 + $0x1], 0 }
   0x2   :  { %13 = vsyncpa [#allocation5], 0 }
   0x3   :  { %15 = vsyncpa [#allocation5 + $0x1], 0  ;;  %s2406_s15 = smov 0   ;;  %s2408_s16 = smov 0  }
   0x4   :  { %s2410_s17 = smov 0   ;;  %s2412_s18 = smov 0  }
   0x5 LB: > { %s2427_s19 = sadd.s32 4294967295, %s2370_s18   ;;  %s2034_s20 = sadd.s32 4294967294, %s2370_s18   ;;  %s2370_s18 = sphi %s2412_s18, %s3759_s18   ;;  %s2366_s17 = sphi %s2410_s17, %s3758_s17   ;;  %s2362_s16 = sphi %s2408_s16, %s3757_s16   ;;  %s2358_s15 = sphi %s2406_s15, %s3756_s15  }
   0x6   : > { %s2431_s21 = sadd.s32 1, %s2370_s18   ;;  %s75_s22 = sadd.s32 1, %s2366_s17 }
   0x7   : > { %s72_s23 = ssub.s32 %s2370_s18, %s2431_s21  ;;  %p85_p0 = scmp.ne.s32.totalorder %s2366_s17, %s2362_s16 }
   0x8   : > { %p73_p1 = scmp.eq.s32.totalorder %s72_s23, 0  ;;  %p86_p2 = scmp.eq.s32.totalorder %s2427_s19, 1 }
   0x9   : > { %p91_p3 = scmp.ne.s32.totalorder %s2362_s16, %s2358_s15  ;;  %p92_p4 = scmp.eq.s32.totalorder %s2034_s20, 1 }
   0xa   : > { %s2444_s24 = scalar_select %p73_p1, %s2366_s17, %s75_s22  }
   0xb   : > { %p2446_p5 = por %p86_p2, %p85_p0  ;;  %p2450_p6 = por %p92_p4, %p91_p3 }
   0xc   : > { %p2037_p7 = scmp.ge.s32.totalorder %s2370_s18, 1  ;;  %p173_p8 = scmp.lt.s32.totalorder %s2370_s18, 3 }
   0xe   : > { %p174_p9 = pnand %p2037_p7, %p173_p8 }
  0x10   : > { %177 = sbr.rel (%p174_p9) target bundleno = 703 (0x2bf), region = 28 }
  0x15   : > { %p207_p10 = scmp.lt.s32.totalorder %s2427_s19, 1  ;;  %vm267_vm0 = vsmask.f32 3328  ;;  %vm268_vm1 = vsmask.f32 7440  ;;  %s2372_s6 = smov 4  }
  0x16   : > { %vm2499_vm2 = vmor %vm267_vm0, %vm268_vm1  ;;  %vm702_vm3 = vcmask 1042432   ;;  %vm703_vm4 = vcmask 1046532   ;;  %s2373_s7 = smov 8   ;;  %s2374_s8 = smov 16   ;;  %vm1303_vm6 = vcmask 31744   ;;  %vm1352_vm7 = vcmask 64512  }
  0x17   : > { %s208_s27 = scalar_select %p207_p10, %s2427_s19, 1  ;;  %vm2786_vm5 = vmor %vm702_vm3, %vm703_vm4  ;;  %vm1636_vm8 = vcmask 1041408   ;;  %vm1385_vm9 = vcmask 97280   ;;  %vm1418_vm10 = vcmask 130048   ;;  %vm1451_vm11 = vcmask 162816  }
  0x18   : > { %s2375_s9 = smov 12   ;;  %s2376_s10 = smov 28   ;;  %vm1484_vm12 = vcmask 195584   ;;  %vm1517_vm13 = vcmask 228352   ;;  %vm1550_vm14 = vcmask 261120   ;;  %vm1603_vm15 = vcmask 293888  }
  0x19   : > { %s2189_s28 = smul.u32 216, %s208_s27  ;;  %s2377_s11 = smov 24  }
  0x1a   : > { %s2378_s12 = smov 20   ;;  %s2379_s13 = smov 32  }
  0x1b   : > { %s2461_s5 = scalar_lea.vmem %s3690_s0, %s2189_s28  ;;  %s3438_s30 = sand.u32 1, %s2362_s16  }
  0x1c   : > { %v2464_v0 = vld [vmem:[%s2461_s5 + $0x30] sm:$0xf]  ;;  %v2467_v1 = vld [vmem:[%s2461_s5 + $0x34] sm:$0xf]  ;;  %v2470_v2 = vld [vmem:[%s2461_s5 + $0x38] sm:$0x1] }
  0x1d   : > { %v367_v3 = vshrl.u32 %v2464_v0, 16  ;;  %v370_v4 = vshll.u32 %v2464_v0, 16  ;;  %v376_v5 = vshll.u32 %v2467_v1, 16  ;;  %v380_v6 = vshrl.u32 %v2467_v1, 16  ;;  %v2477_v7 = vld [vmem:[%s2461_s5 + $0x18] sm:$0xf] }
  0x1e   : > { %v386_v8 = vshll.u32 %v2470_v2, 16  ;;  %v2481_v9 = vld [vmem:[%s2461_s5 + $0x1c] sm:$0xf]  ;;  %v2484_v10 = vld [vmem:[%s2461_s5 + $0x20] sm:$0x1]  ;;  %v319_v11 = vshrl.u32 %v2477_v7, 16 }
  0x1f   : > { %v369_v12 = vrot.slane %v367_v3, 4  ;;  %v372_v13 = vrot.slane %v370_v4, 5  ;;  %v378_v14 = vrot.slane %v376_v5, 5  ;;  %v382_v15 = vrot.slane %v380_v6, 4  ;;  %v2488_v16 = vld [vmem:[%s2461_s5] sm:$0xf] }
  0x20   : > { %v388_v17 = vrot.slane %v386_v8, 5  ;;  %v321_v18 = vrot.slane %v319_v11, 4  ;;  %v322_v19 = vshll.u32 %v2477_v7, 16  ;;  %v328_v20 = vshll.u32 %v2481_v9, 16  ;;  %v2495_v25 = vld [vmem:[%s2461_s5 + $0x4] sm:$0xf] }
  0x21   : > { %v373_v21 = vor.u32 %v372_v13, %v369_v12  ;;  %v383_v22 = vor.u32 %v382_v15, %v378_v14  ;;  %v332_v23 = vshrl.u32 %v2481_v9, 16  ;;  %v338_v24 = vshll.u32 %v2484_v10, 16  ;;  %v2506_v36 = vld [vmem:[%s2461_s5 + $0x8] sm:$0x1]  ;;  %v2515_v44 = vld [vmem:[%s2461_s5 + $0x3c] sm:$0xf] }
  0x22   : > { %v324_v27 = vrot.slane %v322_v19, 5  ;;  %v330_v28 = vrot.slane %v328_v20, 5  ;;  %v271_v29 = vshrl.u32 %v2488_v16, 16  ;;  %v274_v30 = vshll.u32 %v2488_v16, 16  ;;  %v2523_v56 = vld [vmem:[%s2461_s5 + $0x40] sm:$0xf] }
  0x23   : > { %v374_v31 = vrot.slane %v373_v21, 4  ;;  %v384_v32 = vrot.slane %v383_v22, 4  ;;  %v334_v33 = vrot.slane %v332_v23, 4  ;;  %v340_v34 = vrot.slane %v338_v24, 5  ;;  %v2529_v62 = vld [vmem:[%s2461_s5 + $0x44] sm:$0x1] }
  0x24   : > { %v325_v35 = vor.u32 %v324_v27, %v321_v18  ;;  %v273_v37 = vrot.slane %v271_v29, 4  ;;  %v276_v38 = vrot.slane %v274_v30, 5  ;;  %v280_v39 = vshll.u32 %v2495_v25, 16  ;;  %v2532_v63 = vld [vmem:[%s2461_s5 + $0x24] sm:$0xf]  ;;  %s1870_s14 = scalar_lea.sflag [#allocation3], %s3438_s30 }
  0x25   : > { %v379_v40 = vsel %vm2499_vm2, %v374_v31, %v378_v14  ;;  %v389_v41 = vsel %vm2499_vm2, %v384_v32, %v388_v17  ;;  %v335_v42 = vor.u32 %v334_v33, %v330_v28  ;;  %v284_v43 = vshrl.u32 %v2495_v25, 16  ;;  %v2542_v14 = vld [vmem:[%s2461_s5 + $0x28] sm:$0xf]  ;;  %v2548_v19 = vld [vmem:[%s2461_s5 + $0x2c] sm:$0x1]  ;;  %s2268_s29 = scalar_lea.hbm %s3692_s2, 512 }
  0x26   : > { %v941_v45 = vunpack.c.l.b16 %v379_v40  ;;  %v942_v46 = vunpack.c.l.b16 %v389_v41  ;;  %v326_v47 = vrot.slane %v325_v35, 4  ;;  %v277_v48 = vor.u32 %v276_v38, %v273_v37  ;;  %v2555_v27 = vld [vmem:[%s2461_s5 + $0xc] sm:$0xf]  ;;  %v2563_v40 = vld [vmem:[%s2461_s5 + $0x10] sm:$0xf] }
  0x27   : > { %v336_v49 = vrot.slane %v335_v42, 4  ;;  %v282_v50 = vrot.slane %v280_v39, 5  ;;  %v286_v51 = vrot.slane %v284_v43, 4  ;;  %v290_v52 = vshll.u32 %v2506_v36, 16 }
  0x28   : > { %v2518_v53 = vpack.c.b16 %v942_v46, %v941_v45  ;;  %v331_v54 = vsel %vm2499_vm2, %v326_v47, %v330_v28  ;;  %v278_v55 = vrot.slane %v277_v48, 4  ;;  %v391_v57 = vshrl.u32 %v2515_v44, 16  ;;  %v2567_v47 = vld [vmem:[%s2461_s5 + $0x14] sm:$0x1] }
  0x29   : > { %v341_v58 = vsel %vm2499_vm2, %v336_v49, %v340_v34  ;;  %v937_v59 = vunpack.c.l.b16 %v331_v54  ;;  %v287_v60 = vor.u32 %v286_v51, %v282_v50  ;;  %v292_v61 = vrot.slane %v290_v52, 5  ;;  %v2574_v52 = vld [vmem:[%s2461_s5 + $0x60] sm:$0xf] }
  0x2a   : > { %3724 = vst [vmem:[#allocation9_spill] sm:$0xff] %v2518_v53  ;;  %989 = vrot.lane.b32.xlu2 %v2518_v53, %s2372_s6  ;;  %v938_v3 = vunpack.c.l.b16 %v341_v58  ;;  %v283_v4 = vsel %vm2499_vm2, %v278_v55, %v282_v50  ;;  %v393_v5 = vrot.slane %v391_v57, 4  ;;  %v394_v6 = vshll.u32 %v2515_v44, 16  ;;  %v2700_v53 = vld [vmem:[%s2461_s5 + $0x74] sm:$0x1] }
  0x2b   : > { %v288_v8 = vrot.slane %v287_v60, 4  ;;  %v933_v11 = vunpack.c.l.b16 %v283_v4  ;;  %v400_v12 = vshll.u32 %v2523_v56, 16  ;;  %v404_v13 = vshrl.u32 %v2523_v56, 16 }
  0x2c   : > { %v2544_v15 = vpack.c.b16 %v938_v3, %v937_v59  ;;  %v396_v17 = vrot.slane %v394_v6, 5  ;;  %v410_v18 = vshll.u32 %v2529_v62, 16  ;;  %v343_v20 = vshrl.u32 %v2532_v63, 16 }
  0x2d   : > { %v293_v21 = vsel %vm2499_vm2, %v288_v8, %v292_v61  ;;  %v402_v22 = vrot.slane %v400_v12, 5  ;;  %v406_v23 = vrot.slane %v404_v13, 4  ;;  %v346_v24 = vshll.u32 %v2532_v63, 16  ;;  %v2584_v8 = vld [vmem:[%s2461_s5 + $0x64] sm:$0xf] }
  0x2e   : > { %3725 = vst [vmem:[#allocation10_spill] sm:$0xff] %v2544_v15  ;;  %985 = vrot.lane.b32.xlu1 %v2544_v15, %s2372_s6  ;;  %v934_v28 = vunpack.c.l.b16 %v293_v21  ;;  %v397_v29 = vor.u32 %v396_v17, %v393_v5  ;;  %v412_v30 = vrot.slane %v410_v18, 5  ;;  %v345_v31 = vrot.slane %v343_v20, 4  ;;  %v2590_v20 = vld [vmem:[%s2461_s5 + $0x68] sm:$0x1] }
  0x2f   : > { %v407_v32 = vor.u32 %v406_v23, %v402_v22  ;;  %v348_v33 = vrot.slane %v346_v24, 5  ;;  %v352_v34 = vshll.u32 %v2542_v14, 16  ;;  %v356_v35 = vshrl.u32 %v2542_v14, 16  ;;  %v2593_v21 = vld [vmem:[%s2461_s5 + $0x54] sm:$0xf] }
  0x30   : > { %v965_v37 = vpack.c.b16 %v934_v28, %v933_v11  ;;  %v398_v38 = vrot.slane %v397_v29, 4  ;;  %v362_v39 = vshll.u32 %v2548_v19, 16  ;;  %v295_v41 = vshrl.u32 %v2555_v27, 16 }
  0x31   : > { %v408_v42 = vrot.slane %v407_v32, 4  ;;  %v349_v43 = vor.u32 %v348_v33, %v345_v31  ;;  %v354_v45 = vrot.slane %v352_v34, 5  ;;  %v358_v46 = vrot.slane %v356_v35, 4 }
  0x32   : > { %981 = vrot.lane.b32.xlu0 %v965_v37, %s2372_s6  ;;  %v403_v48 = vsel %vm2499_vm2, %v398_v38, %v402_v22  ;;  %v364_v49 = vrot.slane %v362_v39, 5  ;;  %v297_v50 = vrot.slane %v295_v41, 4  ;;  %v298_v51 = vshll.u32 %v2555_v27, 16  ;;  %v2604_v37 = vld [vmem:[%s2461_s5 + $0x58] sm:$0xf] }
  0x33   : > { %v413_v54 = vsel %vm2499_vm2, %v408_v42, %v412_v30  ;;  %v943_v55 = vunpack.c.l.b16 %v403_v48  ;;  %v350_v57 = vrot.slane %v349_v43, 4  ;;  %v359_v58 = vor.u32 %v358_v46, %v354_v45 }
  0x34   : > { %v944_v59 = vunpack.c.l.b16 %v413_v54  ;;  %v300_v60 = vrot.slane %v298_v51, 5  ;;  %v304_v61 = vshll.u32 %v2563_v40, 16  ;;  %v308_v3 = vshrl.u32 %v2563_v40, 16 }
  0x35   : > { %v355_v4 = vsel %vm2499_vm2, %v350_v57, %v354_v45  ;;  %v360_v5 = vrot.slane %v359_v58, 4  ;;  %v314_v6 = vshll.u32 %v2567_v47, 16  ;;  %v463_v11 = vshrl.u32 %v2574_v52, 16  ;;  %v2612_v45 = vld [vmem:[%s2461_s5 + $0x5c] sm:$0x1] }
  0x36   : > { %v2587_v12 = vpack.c.b16 %v944_v59, %v943_v55  ;;  %v939_v13 = vunpack.c.l.b16 %v355_v4  ;;  %v301_v17 = vor.u32 %v300_v60, %v297_v50  ;;  %v306_v18 = vrot.slane %v304_v61, 5  ;;  %v2619_v58 = vld [vmem:[%s2461_s5 + $0x48] sm:$0xf] }
  0x37   : > { %v365_v22 = vsel %vm2499_vm2, %v360_v5, %v364_v49  ;;  %v310_v23 = vrot.slane %v308_v3, 4  ;;  %v316_v24 = vrot.slane %v314_v6, 5  ;;  %v465_v28 = vrot.slane %v463_v11, 4 }
  0x38   : > { %3726 = vst [vmem:[#allocation11_spill] sm:$0xff] %v2587_v12  ;;  %991 = vrot.lane.b32.xlu2 %v2587_v12, %s2372_s6  ;;  %v940_v29 = vunpack.c.l.b16 %v365_v22  ;;  %v302_v30 = vrot.slane %v301_v17, 4  ;;  %v466_v31 = vshll.u32 %v2574_v52, 16  ;;  %v472_v32 = vshll.u32 %v2584_v8, 16  ;;  %v2626_v22 = vld [vmem:[%s2461_s5 + $0x4c] sm:$0xf] }
  0x39   : > { %v311_v33 = vor.u32 %v310_v23, %v306_v18  ;;  %v476_v34 = vshrl.u32 %v2584_v8, 16  ;;  %v482_v35 = vshll.u32 %v2590_v20, 16  ;;  %v439_v38 = vshrl.u32 %v2593_v21, 16  ;;  %v2738_v12 = vld [vmem:[%s2461_s5 + $0xa0] sm:$0xf] }
  0x3a   : > { %v2607_v39 = vpack.c.b16 %v940_v29, %v939_v13  ;;  %v307_v41 = vsel %vm2499_vm2, %v302_v30, %v306_v18  ;;  %v468_v42 = vrot.slane %v466_v31, 5  ;;  %v474_v43 = vrot.slane %v472_v32, 5  ;;  %v2634_v30 = vld [vmem:[%s2461_s5 + $0x50] sm:$0x1]  ;;  %v2638_v32 = vld [vmem:[%s2461_s5 + $0x84] sm:$0xf] }
  0x3b   : > { %v312_v46 = vrot.slane %v311_v33, 4  ;;  %v935_v48 = vunpack.c.l.b16 %v307_v41  ;;  %v478_v49 = vrot.slane %v476_v34, 4  ;;  %v484_v50 = vrot.slane %v482_v35, 5 }
  0x3c   : > { %3727 = vst [vmem:[#allocation12_spill] sm:$0xff] %v2607_v39  ;;  %987 = vrot.lane.b32.xlu1 %v2607_v39, %s2372_s6  ;;  %v469_v51 = vor.u32 %v468_v42, %v465_v28  ;;  %v441_v54 = vrot.slane %v439_v38, 4  ;;  %v442_v55 = vshll.u32 %v2593_v21, 16  ;;  %v448_v57 = vshll.u32 %v2604_v37, 16 }
  0x3d   : > { %v317_v59 = vsel %vm2499_vm2, %v312_v46, %v316_v24  ;;  %v479_v60 = vor.u32 %v478_v49, %v474_v43  ;;  %v452_v61 = vshrl.u32 %v2604_v37, 16  ;;  %v458_v3 = vshll.u32 %v2612_v45, 16 }
  0x3e   : > { %v936_v4 = vunpack.c.l.b16 %v317_v59  ;;  %v470_v5 = vrot.slane %v469_v51, 4  ;;  %v444_v6 = vrot.slane %v442_v55, 5  ;;  %v450_v11 = vrot.slane %v448_v57, 5 }
  0x3f   : > { %v480_v13 = vrot.slane %v479_v60, 4  ;;  %v454_v17 = vrot.slane %v452_v61, 4  ;;  %v460_v18 = vrot.slane %v458_v3, 5  ;;  %v415_v23 = vshrl.u32 %v2619_v58, 16  ;;  %v2653_v60 = vld [vmem:[%s2461_s5 + $0x88] sm:$0xf] }
  0x40   : > { %v2629_v28 = vpack.c.b16 %v936_v4, %v935_v48  ;;  %v475_v24 = vsel %vm2499_vm2, %v470_v5, %v474_v43  ;;  %v445_v29 = vor.u32 %v444_v6, %v441_v54  ;;  %v418_v31 = vshll.u32 %v2619_v58, 16  ;;  %v2656_v61 = vld [vmem:[%s2461_s5 + $0x8c] sm:$0x1] }
  0x41   : > { %v485_v33 = vsel %vm2499_vm2, %v480_v13, %v484_v50  ;;  %v949_v34 = vunpack.c.l.b16 %v475_v24  ;;  %v455_v35 = vor.u32 %v454_v17, %v450_v11  ;;  %v417_v38 = vrot.slane %v415_v23, 4  ;;  %3730 = vst [vmem:[#allocation15_spill] sm:$0xff] %v2656_v61  ;;  %v2661_v13 = vld [vmem:[%s2461_s5 + $0x78] sm:$0xf] }
  0x42   : > { %3728 = vst [vmem:[#allocation13_spill] sm:$0xff] %v2629_v28  ;;  %983 = vrot.lane.b32.xlu0 %v2629_v28, %s2372_s6  ;;  %v950_v41 = vunpack.c.l.b16 %v485_v33  ;;  %v446_v42 = vrot.slane %v445_v29, 4  ;;  %v420_v43 = vrot.slane %v418_v31, 5  ;;  %v424_v46 = vshll.u32 %v2626_v22, 16  ;;  %v2746_v28 = vld [vmem:[%s2461_s5 + $0xa4] sm:$0x1] }
  0x43   : > { %v456_v48 = vrot.slane %v455_v35, 4  ;;  %v428_v49 = vshrl.u32 %v2626_v22, 16  ;;  %v434_v51 = vshll.u32 %v2634_v30, 16  ;;  %v535_v50 = vshrl.u32 %v2638_v32, 16 }
  0x44   : > { %v2648_v54 = vpack.c.b16 %v950_v41, %v949_v34  ;;  %v451_v55 = vsel %vm2499_vm2, %v446_v42, %v450_v11  ;;  %v421_v57 = vor.u32 %v420_v43, %v417_v38  ;;  %v426_v59 = vrot.slane %v424_v46, 5  ;;  %v2674_v41 = vld [vmem:[%s2461_s5 + $0x7c] sm:$0xf] }
  0x45   : > { %v461_v3 = vsel %vm2499_vm2, %v456_v48, %v460_v18  ;;  %v947_v4 = vunpack.c.l.b16 %v451_v55  ;;  %v430_v5 = vrot.slane %v428_v49, 4  ;;  %v436_v6 = vrot.slane %v434_v51, 5  ;;  %v2678_v51 = vld [vmem:[%s2461_s5 + $0x80] sm:$0x1] }
  0x46   : > { %3729 = vst [vmem:[#allocation14_spill] sm:$0xff] %v2648_v54  ;;  %997 = vrot.lane.b32.xlu2 %v2648_v54, %s2372_s6  ;;  %v948_v17 = vunpack.c.l.b16 %v461_v3  ;;  %v422_v11 = vrot.slane %v421_v57, 4  ;;  %v537_v23 = vrot.slane %v535_v50, 4  ;;  %v538_v24 = vshll.u32 %v2638_v32, 16  ;;  %v2684_v3 = vld [vmem:[%s2461_s5 + $0x6c] sm:$0xf] }
  0x47   : > { %v431_v29 = vor.u32 %v430_v5, %v426_v59  ;;  %v544_v31 = vshll.u32 %v2653_v60, 16  ;;  %v548_v18 = vshrl.u32 %v2653_v60, 16  ;;  %v554_v33 = vshll.u32 %v2656_v61, 16 }
  0x48   : > { %v2669_v34 = vpack.c.b16 %v948_v17, %v947_v4  ;;  %v427_v35 = vsel %vm2499_vm2, %v422_v11, %v426_v59  ;;  %v540_v38 = vrot.slane %v538_v24, 5  ;;  %v511_v42 = vshrl.u32 %v2661_v13, 16 }
  0x49   : > { %v432_v43 = vrot.slane %v431_v29, 4  ;;  %v945_v46 = vunpack.c.l.b16 %v427_v35  ;;  %v546_v48 = vrot.slane %v544_v31, 5  ;;  %v550_v49 = vrot.slane %v548_v18, 4 }
  0x4a   : > { %3731 = vst [vmem:[#allocation16_spill] sm:$0xff] %v2669_v34  ;;  %995 = vrot.lane.b32.xlu1 %v2669_v34, %s2372_s6  ;;  %v541_v50 = vor.u32 %v540_v38, %v537_v23  ;;  %v556_v55 = vrot.slane %v554_v33, 5  ;;  %v513_v57 = vrot.slane %v511_v42, 4  ;;  %v514_v59 = vshll.u32 %v2661_v13, 16  ;;  %v2692_v38 = vld [vmem:[%s2461_s5 + $0x70] sm:$0xf] }
  0x4b   : > { %v437_v4 = vsel %vm2499_vm2, %v432_v43, %v436_v6  ;;  %v551_v5 = vor.u32 %v550_v49, %v546_v48  ;;  %v520_v17 = vshll.u32 %v2674_v41, 16  ;;  %v524_v11 = vshrl.u32 %v2674_v41, 16 }
  0x4c   : > { %v946_v24 = vunpack.c.l.b16 %v437_v4  ;;  %v542_v29 = vrot.slane %v541_v50, 4  ;;  %v516_v23 = vrot.slane %v514_v59, 5  ;;  %v530_v31 = vshll.u32 %v2678_v51, 16  ;;  %v2703_v50 = vld [vmem:[%s2461_s5 + $0xa8] sm:$0xf] }
  0x4d   : > { %v552_v18 = vrot.slane %v551_v5, 4  ;;  %v522_v33 = vrot.slane %v520_v17, 5  ;;  %v526_v35 = vrot.slane %v524_v11, 4  ;;  %v487_v42 = vshrl.u32 %v2684_v3, 16  ;;  %3733 = vst [vmem:[#allocation18_spill] sm:$0xff] %v2703_v50 }
  0x4e   : > { %v2695_v6 = vpack.c.b16 %v946_v24, %v945_v46  ;;  %v547_v43 = vsel %vm2499_vm2, %v542_v29, %v546_v48  ;;  %v517_v49 = vor.u32 %v516_v23, %v513_v57  ;;  %v532_v54 = vrot.slane %v530_v31, 5 }
  0x4f   : > { %v557_v59 = vsel %vm2499_vm2, %v552_v18, %v556_v55  ;;  %v955_v4 = vunpack.c.l.b16 %v547_v43  ;;  %v527_v5 = vor.u32 %v526_v35, %v522_v33  ;;  %v489_v17 = vrot.slane %v487_v42, 4  ;;  %v2719_v43 = vld [vmem:[%s2461_s5 + $0xac] sm:$0xf] }
  0x50   : > { %3732 = vst [vmem:[#allocation17_spill] sm:$0xff] %v2695_v6  ;;  %993 = vrot.lane.b32.xlu0 %v2695_v6, %s2372_s6  ;;  %v956_v46 = vunpack.c.l.b16 %v557_v59  ;;  %v518_v11 = vrot.slane %v517_v49, 4  ;;  %v490_v48 = vshll.u32 %v2684_v3, 16  ;;  %v496_v57 = vshll.u32 %v2692_v38, 16  ;;  %v2722_v49 = vld [vmem:[%s2461_s5 + $0xb0] sm:$0x1] }
  0x51   : > { %v528_v24 = vrot.slane %v527_v5, 4  ;;  %v500_v29 = vshrl.u32 %v2692_v38, 16  ;;  %v506_v55 = vshll.u32 %v2700_v53, 16  ;;  %v607_v23 = vshrl.u32 %v2703_v50, 16  ;;  %3735 = vst [vmem:[#allocation20_spill] sm:$0xff] %v2719_v43 }
  0x52   : > { %v2714_v31 = vpack.c.b16 %v956_v46, %v955_v4  ;;  %v523_v18 = vsel %vm2499_vm2, %v518_v11, %v522_v33  ;;  %v492_v35 = vrot.slane %v490_v48, 5  ;;  %v498_v42 = vrot.slane %v496_v57, 5  ;;  %3736 = vst [vmem:[#allocation21_spill] sm:$0xff] %v2722_v49  ;;  %v2727_v6 = vld [vmem:[%s2461_s5 + $0x9c] sm:$0xf] }
  0x53   : > { %v533_v59 = vsel %vm2499_vm2, %v528_v24, %v532_v54  ;;  %v953_v5 = vunpack.c.l.b16 %v523_v18  ;;  %v502_v34 = vrot.slane %v500_v29, 4  ;;  %v508_v39 = vrot.slane %v506_v55, 5 }
  0x54   : > { %3734 = vst [vmem:[#allocation19_spill] sm:$0xff] %v2714_v31  ;;  %1003 = vrot.lane.b32.xlu2 %v2714_v31, %s2372_s6  ;;  %v954_v4 = vunpack.c.l.b16 %v533_v59  ;;  %v493_v33 = vor.u32 %v492_v35, %v489_v17  ;;  %v609_v46 = vrot.slane %v607_v23, 4  ;;  %v610_v11 = vshll.u32 %v2703_v50, 16 }
  0x55   : > { %v503_v48 = vor.u32 %v502_v34, %v498_v42  ;;  %v616_v57 = vshll.u32 %v2719_v43, 16  ;;  %v620_v54 = vshrl.u32 %v2719_v43, 16  ;;  %v626_v24 = vshll.u32 %v2722_v49, 16 }
  0x56   : > { %v2735_v29 = vpack.c.b16 %v954_v4, %v953_v5  ;;  %v494_v55 = vrot.slane %v493_v33, 4  ;;  %v612_v18 = vrot.slane %v610_v11, 5  ;;  %v583_v17 = vshrl.u32 %v2727_v6, 16  ;;  %v2750_v33 = vld [vmem:[%s2461_s5 + $0x90] sm:$0xf] }
  0x57   : > { %v504_v23 = vrot.slane %v503_v48, 4  ;;  %v618_v35 = vrot.slane %v616_v57, 5  ;;  %v622_v59 = vrot.slane %v620_v54, 4  ;;  %v628_v34 = vrot.slane %v626_v24, 5 }
  0x58   : > { %3737 = vst [vmem:[#allocation22_spill] sm:$0xff] %v2735_v29  ;;  %1001 = vrot.lane.b32.xlu1 %v2735_v29, %s2372_s6  ;;  %v499_v31 = vsel %vm2499_vm2, %v494_v55, %v498_v42  ;;  %v613_v15 = vor.u32 %v612_v18, %v609_v46  ;;  %v585_v5 = vrot.slane %v583_v17, 4  ;;  %v586_v4 = vshll.u32 %v2727_v6, 16 }
  0x59   : > { %v509_v11 = vsel %vm2499_vm2, %v504_v23, %v508_v39  ;;  %v951_v48 = vunpack.c.l.b16 %v499_v31  ;;  %v623_v57 = vor.u32 %v622_v59, %v618_v35  ;;  %v592_v54 = vshll.u32 %v2738_v12, 16  ;;  %v2763_v59 = vld [vmem:[%s2461_s5 + $0x94] sm:$0xf] }
  0x5a   : > { %v952_v24 = vunpack.c.l.b16 %v509_v11  ;;  %v614_v29 = vrot.slane %v613_v15, 4  ;;  %v588_v42 = vrot.slane %v586_v4, 5  ;;  %v596_v46 = vshrl.u32 %v2738_v12, 16  ;;  %v2766_v11 = vld [vmem:[%s2461_s5 + $0x98] sm:$0x1] }
  0x5b   : > { %v624_v55 = vrot.slane %v623_v57, 4  ;;  %v594_v18 = vrot.slane %v592_v54, 5  ;;  %v602_v17 = vshll.u32 %v2746_v28, 16  ;;  %v559_v49 = vshrl.u32 %v2750_v33, 16 }
  0x5c   : > { %v2758_v43 = vpack.c.b16 %v952_v24, %v951_v48  ;;  %v619_v39 = vsel %vm2499_vm2, %v614_v29, %v618_v35  ;;  %v589_v31 = vor.u32 %v588_v42, %v585_v5  ;;  %v598_v23 = vrot.slane %v596_v46, 4 }
  0x5d   : > { %v629_v15 = vsel %vm2499_vm2, %v624_v55, %v628_v34  ;;  %v961_v4 = vunpack.c.l.b16 %v619_v39  ;;  %v604_v57 = vrot.slane %v602_v17, 5  ;;  %v561_v54 = vrot.slane %v559_v49, 4 }
  0x5e   : > { %3738 = vst [vmem:[#allocation23_spill] sm:$0xff] %v2758_v43  ;;  %999 = vrot.lane.b32.xlu0 %v2758_v43, %s2372_s6  ;;  %v962_v48 = vunpack.c.l.b16 %v629_v15  ;;  %v590_v24 = vrot.slane %v589_v31, 4  ;;  %v599_v50 = vor.u32 %v598_v23, %v594_v18  ;;  %v562_v29 = vshll.u32 %v2750_v33, 16 }
  0x5f   : > { %v568_v35 = vshll.u32 %v2763_v59, 16  ;;  %v572_v5 = vshrl.u32 %v2763_v59, 16  ;;  %v578_v42 = vshll.u32 %v2766_v11, 16 }
  0x60   : > { %v2776_v46 = vpack.c.b16 %v962_v48, %v961_v4  ;;  %v595_v49 = vsel %vm2499_vm2, %v590_v24, %v594_v18  ;;  %v600_v34 = vrot.slane %v599_v50, 4  ;;  %v564_v55 = vrot.slane %v562_v29, 5 }
  0x61   : > { %v959_v17 = vunpack.c.l.b16 %v595_v49  ;;  %v570_v39 = vrot.slane %v568_v35, 5  ;;  %v574_v31 = vrot.slane %v572_v5, 4  ;;  %v580_v23 = vrot.slane %v578_v42, 5 }
  0x62   : > { %1009 = vrot.lane.b32.xlu2 %v2776_v46, %s2372_s6  ;;  %v605_v15 = vsel %vm2499_vm2, %v600_v34, %v604_v57  ;;  %v565_v43 = vor.u32 %v564_v55, %v561_v54  ;;  %v2041_v4 = vrot.slane %v2555_v27, 9  ;;  %v714_v18 = vrot.slane %v2563_v40, 5  ;;  %v2800_v34 = vld [vmem:[%s2461_s5 + $0xb4] sm:$0xf] }
  0x63   : > { %v960_v48 = vunpack.c.l.b16 %v605_v15  ;;  %v575_v61 = vor.u32 %v574_v31, %v570_v39  ;;  %v717_v24 = vrot.slane %v2567_v47, 5  ;;  %v2040_v57 = vrot.slane %v2488_v16, 9  ;;  %v2816_v31 = vld [vmem:[%s2461_s5 + $0xbc] sm:$0x1] }
  0x64   : > { %v566_v29 = vrot.slane %v565_v43, 4  ;;  %v707_v54 = vrot.slane %v2495_v25, 5  ;;  %v710_v35 = vrot.slane %v2506_v36, 5  ;;  %v715_v42 = vsel %vm2786_vm5, %v2041_v4, %v714_v18  ;;  %v2807_v43 = vld [vmem:[%s2461_s5 + $0xb8] sm:$0xf] }
  0x65   : > { %v2795_v27 = vpack.c.b16 %v960_v48, %v959_v17  ;;  %v576_v5 = vrot.slane %v575_v61, 4  ;;  %v716_v49 = vrot.slane %v714_v18, 4  ;;  %v1015_v47 = vunpack.c.l.b16 %v715_v42 }
  0x66   : > { %v571_v40 = vsel %vm2499_vm2, %v566_v29, %v570_v39  ;;  %v708_v16 = vsel %vm2786_vm5, %v2040_v57, %v707_v54  ;;  %v709_v25 = vrot.slane %v707_v54, 4  ;;  %v631_v48 = vshrl.u32 %v2800_v34, 16 }
  0x67   : > { %1007 = vrot.lane.b32.xlu1 %v2795_v27, %s2372_s6  ;;  %v581_v36 = vsel %vm2499_vm2, %v576_v5, %v580_v23  ;;  %v957_v61 = vunpack.c.l.b16 %v571_v40  ;;  %v718_v55 = vsel %vm2786_vm5, %v716_v49, %v717_v24  ;;  %v1013_v17 = vunpack.c.l.b16 %v708_v16 }
  0x68   : > { %v958_v39 = vunpack.c.l.b16 %v581_v36  ;;  %v1016_v15 = vunpack.c.l.b16 %v718_v55  ;;  %v711_v4 = vsel %vm2786_vm5, %v709_v25, %v710_v35  ;;  %v634_v29 = vshll.u32 %v2800_v34, 16 }
  0x69   : > { %v1014_v18 = vunpack.c.l.b16 %v711_v4  ;;  %v640_v57 = vshll.u32 %v2807_v43, 16  ;;  %v644_v23 = vshrl.u32 %v2807_v43, 16  ;;  %v633_v5 = vrot.slane %v631_v48, 4 }
  0x6a   : > { %v2824_v54 = vpack.c.b16 %v958_v39, %v957_v61  ;;  %v2826_v24 = vpack.c.b16 %v1016_v15, %v1015_v47  ;;  %v650_v42 = vshll.u32 %v2816_v31, 16  ;;  %v636_v40 = vrot.slane %v634_v29, 5 }
  0x6b   : > { %v1045_v49 = vpack.c.b16 %v1014_v18, %v1013_v17  ;;  %v642_v16 = vrot.slane %v640_v57, 5  ;;  %v646_v35 = vrot.slane %v644_v23, 4  ;;  %v2044_v36 = vrot.slane %v2464_v0, 9 }
  0x6c   : > { %1005 = vrot.lane.b32.xlu0 %v2824_v54, %s2372_s6  ;;  %1063 = vrot.lane.b32.xlu2 %v2826_v24, %s2373_s7  ;;  %v652_v25 = vrot.slane %v650_v42, 5  ;;  %v735_v47 = vrot.slane %v2467_v1, 5  ;;  %v738_v61 = vrot.slane %v2470_v2, 5  ;;  %v637_v55 = vor.u32 %v636_v40, %v633_v5 }
  0x6d   : > { %v647_v39 = vor.u32 %v646_v35, %v642_v16  ;;  %v2043_v17 = vrot.slane %v2532_v63, 9  ;;  %v728_v15 = vrot.slane %v2542_v14, 5  ;;  %v731_v18 = vrot.slane %v2548_v19, 5 }
  0x6e   : > { %v736_v4 = vsel %vm2786_vm5, %v2044_v36, %v735_v47  ;;  %v737_v48 = vrot.slane %v735_v47, 4  ;;  %v2042_v29 = vrot.slane %v2477_v7, 9  ;;  %v638_v0 = vrot.slane %v637_v55, 4 }
  0x6f   : > { %1061 = vrot.lane.b32.xlu1 %v1045_v49, %s2373_s7  ;;  %v648_v1 = vrot.slane %v647_v39, 4  ;;  %v1021_v57 = vunpack.c.l.b16 %v736_v4  ;;  %v729_v2 = vsel %vm2786_vm5, %v2043_v17, %v728_v15  ;;  %v730_v14 = vrot.slane %v728_v15, 4 }
  0x70   : > { %v739_v63 = vsel %vm2786_vm5, %v737_v48, %v738_v61  ;;  %v1019_v23 = vunpack.c.l.b16 %v729_v2  ;;  %v721_v5 = vrot.slane %v2481_v9, 5  ;;  %v643_v19 = vsel %vm2499_vm2, %v638_v0, %v642_v16 }
  0x71   : > { %v653_v7 = vsel %vm2499_vm2, %v648_v1, %v652_v25  ;;  %v1022_v42 = vunpack.c.l.b16 %v739_v63  ;;  %v724_v49 = vrot.slane %v2484_v10, 5  ;;  %v963_v40 = vunpack.c.l.b16 %v643_v19 }
  0x72   : > { %v964_v35 = vunpack.c.l.b16 %v653_v7  ;;  %v732_v36 = vsel %vm2786_vm5, %v730_v14, %v731_v18  ;;  %v722_v47 = vsel %vm2786_vm5, %v2042_v29, %v721_v5  ;;  %v723_v55 = vrot.slane %v721_v5, 4 }
  0x73   : > { %v2857_v61 = vpack.c.b16 %v1022_v42, %v1021_v57  ;;  %v1020_v9 = vunpack.c.l.b16 %v732_v36  ;;  %v1017_v39 = vunpack.c.l.b16 %v722_v47  ;;  %v2047_v25 = vrot.slane %v2593_v21, 9 }
  0x74   : > { %v2859_v16 = vpack.c.b16 %v964_v35, %v963_v40  ;;  %v756_v17 = vrot.slane %v2604_v37, 5  ;;  %v759_v10 = vrot.slane %v2612_v45, 5  ;;  %v725_v4 = vsel %vm2786_vm5, %v723_v55, %v724_v49 }
  0x75   : > { %1069 = vrot.lane.b32.xlu2 %v2857_v61, %s2373_s7  ;;  %v2866_v15 = vpack.c.b16 %v1020_v9, %v1019_v23  ;;  %v2046_v48 = vrot.slane %v2619_v58, 9  ;;  %v749_v18 = vrot.slane %v2626_v22, 5  ;;  %v1018_v21 = vunpack.c.l.b16 %v725_v4 }
  0x76   : > { %1011 = vrot.lane.b32.xlu0 %v2859_v16, %s2372_s6  ;;  %v757_v37 = vsel %vm2786_vm5, %v2047_v25, %v756_v17  ;;  %v758_v45 = vrot.slane %v756_v17, 4  ;;  %v752_v29 = vrot.slane %v2634_v30, 5  ;;  %v2045_v22 = vrot.slane %v2515_v44, 9 }
  0x77   : > { %1067 = vrot.lane.b32.xlu1 %v2866_v15, %s2373_s7  ;;  %v1027_v0 = vunpack.c.l.b16 %v757_v37  ;;  %v750_v1 = vsel %vm2786_vm5, %v2046_v48, %v749_v18  ;;  %v751_v58 = vrot.slane %v749_v18, 4  ;;  %v2882_v57 = vpack.c.b16 %v1018_v21, %v1017_v39 }
  0x78   : > { %v760_v2 = vsel %vm2786_vm5, %v758_v45, %v759_v10  ;;  %v1025_v63 = vunpack.c.l.b16 %v750_v1  ;;  %v742_v14 = vrot.slane %v2523_v56, 5  ;;  %v745_v5 = vrot.slane %v2529_v62, 5 }
  0x79   : > { %v1028_v23 = vunpack.c.l.b16 %v760_v2  ;;  %v753_v30 = vsel %vm2786_vm5, %v751_v58, %v752_v29  ;;  %v2050_v19 = vrot.slane %v2661_v13, 9  ;;  %v777_v49 = vrot.slane %v2674_v41, 5 }
  0x7a   : > { %v1026_v7 = vunpack.c.l.b16 %v753_v30  ;;  %v743_v44 = vsel %vm2786_vm5, %v2045_v22, %v742_v14  ;;  %v744_v42 = vrot.slane %v742_v14, 4  ;;  %v780_v56 = vrot.slane %v2678_v51, 5 }
  0x7b   : > { %v2894_v40 = vpack.c.b16 %v1028_v23, %v1027_v0  ;;  %v1023_v35 = vunpack.c.l.b16 %v743_v44  ;;  %v2049_v36 = vrot.slane %v2684_v3, 9  ;;  %v778_v13 = vsel %vm2786_vm5, %v2050_v19, %v777_v49  ;;  %v3741_v44 = vld [vmem:[#allocation15_spill] sm:$0xff] }
  0x7c   : > { %v2898_v47 = vpack.c.b16 %v1026_v7, %v1025_v63  ;;  %v746_v62 = vsel %vm2786_vm5, %v744_v42, %v745_v5  ;;  %v779_v9 = vrot.slane %v777_v49, 4  ;;  %v1033_v55 = vunpack.c.l.b16 %v778_v13  ;;  %v3742_v49 = vld [vmem:[#allocation18_spill] sm:$0xff] }
  0x7d   : > { %1075 = vrot.lane.b32.xlu2 %v2894_v40, %s2373_s7  ;;  %v1024_v41 = vunpack.c.l.b16 %v746_v62  ;;  %v770_v39 = vrot.slane %v2692_v38, 5  ;;  %v773_v51 = vrot.slane %v2700_v53, 5  ;;  %v2048_v25 = vrot.slane %v2574_v52, 9  ;;  %v3744_v62 = vld [vmem:[#allocation21_spill] sm:$0xff] }
  0x7e   : > { %1065 = vrot.lane.b32.xlu0 %v2882_v57, %s2373_s7  ;;  %v781_v3 = vsel %vm2786_vm5, %v779_v9, %v780_v56  ;;  %v763_v17 = vrot.slane %v2584_v8, 5  ;;  %v766_v10 = vrot.slane %v2590_v20, 5  ;;  %v2053_v37 = vrot.slane %v2727_v6, 9  ;;  %v3743_v56 = vld [vmem:[#allocation20_spill] sm:$0xff] }
  0x7f   : > { %1073 = vrot.lane.b32.xlu1 %v2898_v47, %s2373_s7  ;;  %v1034_v4 = vunpack.c.l.b16 %v781_v3  ;;  %v771_v38 = vsel %vm2786_vm5, %v2049_v36, %v770_v39  ;;  %v772_v53 = vrot.slane %v770_v39, 4  ;;  %v2922_v52 = vpack.c.b16 %v1024_v41, %v1023_v35 }
  0x80   : > { %v1031_v48 = vunpack.c.l.b16 %v771_v38  ;;  %v764_v18 = vsel %vm2786_vm5, %v2048_v25, %v763_v17  ;;  %v765_v21 = vrot.slane %v763_v17, 4  ;;  %v798_v45 = vrot.slane %v2738_v12, 5 }
  0x81   : > { %v2924_v8 = vpack.c.b16 %v1034_v4, %v1033_v55  ;;  %v774_v20 = vsel %vm2786_vm5, %v772_v53, %v773_v51  ;;  %v801_v1 = vrot.slane %v2746_v28, 5  ;;  %v2052_v58 = vrot.slane %v2750_v33, 9 }
  0x82   : > { %v1032_v29 = vunpack.c.l.b16 %v774_v20  ;;  %v767_v0 = vsel %vm2786_vm5, %v765_v21, %v766_v10  ;;  %v1029_v22 = vunpack.c.l.b16 %v764_v18  ;;  %v799_v6 = vsel %vm2786_vm5, %v2053_v37, %v798_v45  ;;  %v2160_v37 = vld [vmem:[%s2461_s5 + $0xc] sm:$0xff] }
  0x83   : > { %v800_v2 = vrot.slane %v798_v45, 4  ;;  %v791_v63 = vrot.slane %v2763_v59, 5  ;;  %v1030_v23 = vunpack.c.l.b16 %v767_v0  ;;  %v794_v12 = vrot.slane %v2766_v11, 5  ;;  %v3745_v45 = vld [vmem:[#allocation13_spill] sm:$0xff]  ;;  %v3746_v0 = vld [vmem:[#allocation10_spill] sm:$0xff] }
  0x84   : > { %v2936_v14 = vpack.c.b16 %v1032_v29, %v1031_v48  ;;  %v2051_v30 = vrot.slane %v2638_v32, 9  ;;  %v1039_v33 = vunpack.c.l.b16 %v799_v6  ;;  %v784_v11 = vrot.slane %v2653_v60, 5  ;;  %v990_v20 = vpop.permute.xlu2 %989  ;;  %v2161_v29 = vld [vmem:[%s2461_s5 + $0x18] sm:$0xff] }
  0x85   : > { %1081 = vrot.lane.b32.xlu2 %v2924_v8, %s2373_s7  ;;  %v802_v28 = vsel %vm2786_vm5, %v800_v2, %v801_v1  ;;  %v792_v5 = vsel %vm2786_vm5, %v2052_v58, %v791_v63  ;;  %v793_v19 = vrot.slane %v791_v63, 4  ;;  %v787_v32 = vrot.slane %v3741_v44, 5  ;;  %v3035_v44 = vld [vmem:[%s2461_s5 + $0x6c] sm:$0xff] }
  0x86   : > { %1071 = vrot.lane.b32.xlu0 %v2922_v52, %s2373_s7  ;;  %v1040_v59 = vunpack.c.l.b16 %v802_v28  ;;  %v1037_v7 = vunpack.c.l.b16 %v792_v5  ;;  %v2054_v35 = vrot.slane %v3742_v49, 9  ;;  %v805_v36 = vrot.slane %v3743_v56, 5  ;;  %v2165_v28 = vld [vmem:[%s2461_s5 + $0x48] sm:$0xff]  ;;  %v3750_v49 = vld [vmem:[#allocation12_spill] sm:$0xff] }
  0x87   : > { %1079 = vrot.lane.b32.xlu1 %v2936_v14, %s2373_s7  ;;  %v795_v42 = vsel %vm2786_vm5, %v793_v19, %v794_v12  ;;  %v808_v13 = vrot.slane %v3744_v62, 5  ;;  %v785_v41 = vsel %vm2786_vm5, %v2051_v30, %v784_v11  ;;  %v786_v55 = vrot.slane %v784_v11, 4  ;;  %v3747_v30 = vld [vmem:[#allocation11_spill] sm:$0xff] }
  0x88   : > { %v1038_v9 = vunpack.c.l.b16 %v795_v42  ;;  %v2959_v60 = vpack.c.b16 %v1040_v59, %v1039_v33  ;;  %v1035_v39 = vunpack.c.l.b16 %v785_v41  ;;  %v806_v51 = vsel %vm2786_vm5, %v2054_v35, %v805_v36  ;;  %v3748_v59 = vld [vmem:[#allocation17_spill] sm:$0xff]  ;;  %v3749_v42 = vld [vmem:[#allocation23_spill] sm:$0xff]  ;;  %v3751_v41 = vld [vmem:[#allocation22_spill] sm:$0xff] }
  0x89   : > { %v807_v3 = vrot.slane %v805_v36, 4  ;;  %v2963_v25 = vpack.c.b16 %v1030_v23, %v1029_v22  ;;  %v788_v17 = vsel %vm2786_vm5, %v786_v55, %v787_v32  ;;  %v1041_v10 = vunpack.c.l.b16 %v806_v51  ;;  %v2996_v22 = vld [vmem:[%s2461_s5 + $0x3c] sm:$0xff]  ;;  %v2162_v23 = vld [vmem:[%s2461_s5 + $0x24] sm:$0xff] }
  0x8a   : > { %v2967_v4 = vpack.c.b16 %v1038_v9, %v1037_v7  ;;  %v1036_v38 = vunpack.c.l.b16 %v788_v17  ;;  %v2169_v36 = vld [vmem:[%s2461_s5 + $0x78] sm:$0xff] }
  0x8b   : > { %v809_v53 = vsel %vm2786_vm5, %v807_v3, %v808_v13  ;;  %v3049_v13 = vld [vmem:[%s2461_s5 + $0x30] sm:$0xff] }
  0x8c   : > { %v1042_v48 = vunpack.c.l.b16 %v809_v53  ;;  %v2973_v18 = vpack.c.b16 %v1036_v38, %v1035_v39  ;;  %v1318_v55 = vsel %vm1303_vm6, %v3049_v13, %v990_v20  ;;  %v3063_v3 = vld [vmem:[%s2461_s5 + $0x54] sm:$0xff] }
  0x8d   : > { %1087 = vrot.lane.b32.xlu2 %v2959_v60, %s2373_s7 }
  0x8e   : > { %1077 = vrot.lane.b32.xlu0 %v2963_v25, %s2373_s7  ;;  %v2977_v21 = vpack.c.b16 %v1042_v48, %v1041_v10 }
  0x8f   : > { %1085 = vrot.lane.b32.xlu1 %v2967_v4, %s2373_s7 }
  0x92   : > { %v2992_v1 = vpop.permute.xlu2 %991 }
  0x95   : > { %1131 = vrot.lane.b32.xlu2 %v3745_v45, %s2374_s8 }
  0x96   : > { %1083 = vrot.lane.b32.xlu0 %v2973_v18, %s2373_s7 }
  0x97   : > { %1096 = vrot.lane.b32.xlu1 %v2160_v37, %s2375_s9 }
  0x9d   : > { %1236 = vrot.lane.b32.xlu2 %v3746_v0, %s2376_s10 }
  0x9e   : > { %1089 = vrot.lane.b32.xlu0 %v2977_v21, %s2373_s7 }
  0x9f   : > { %1201 = vrot.lane.b32.xlu1 %v2161_v29, %s2377_s11 }
  0xa0   : > { %v986_v58 = vpop.permute.xlu1 %985  ;;  %v3006_v2 = vpop.permute.xlu2 %997 }
  0xa1   : > { %v2999_v6 = vsel %vm1303_vm6, %v2161_v29, %v986_v58 }
  0xa4   : > { %v3008_v63 = vpop.permute.xlu0 %981 }
  0xa5   : > { %1104 = vrot.lane.b32.xlu2 %v2996_v22, %s2375_s9 }
  0xa6   : > { %1166 = vrot.lane.b32.xlu0 %v2826_v24, %s2378_s12 }
  0xa7   : > { %1098 = vrot.lane.b32.xlu1 %v2161_v29, %s2375_s9 }
  0xad   : > { %1168 = vrot.lane.b32.xlu2 %v2882_v57, %s2378_s12 }
  0xae   : > { %1271 = vrot.lane.b32.xlu0 %v2882_v57, %s2379_s13  ;;  %v988_v12 = vpop.permute.xlu1 %987  ;;  %v3019_v33 = vpop.permute.xlu2 %1003 }
  0xaf   : > { %1139 = vrot.lane.b32.xlu1 %v3747_v30, %s2374_s8  ;;  %v1315_v24 = vsel %vm1303_vm6, %v2162_v23, %v988_v12 }
  0xb4   : > { %v984_v5 = vpop.permute.xlu0 %983 }
  0xb5   : > { %1209 = vrot.lane.b32.xlu2 %v2165_v28, %s2377_s11  ;;  %v1309_v19 = vsel %vm1303_vm6, %v2160_v37, %v984_v5 }
  0xb6   : > { %1133 = vrot.lane.b32.xlu0 %v3746_v0, %s2374_s8  ;;  %v3086_v0 = vld [vmem:[%s2461_s5 + $0x9c] sm:$0xff] }
  0xb7   : > { %1203 = vrot.lane.b32.xlu1 %v2162_v23, %s2377_s11 }
  0xbc   : > { %v3026_v57 = vpop.permute.xlu2 %1009  ;;  %v996_v7 = vpop.permute.xlu1 %995 }
  0xbd   : > { %1273 = vrot.lane.b32.xlu2 %v2866_v15, %s2379_s13  ;;  %v1327_v10 = vsel %vm1303_vm6, %v3063_v3, %v996_v7 }
  0xbe   : > { %1174 = vrot.lane.b32.xlu0 %v2922_v52, %s2378_s12 }
  0xbf   : > { %1244 = vrot.lane.b32.xlu1 %v3748_v59, %s2376_s10 }
  0xc2   : > { %v994_v11 = vpop.permute.xlu0 %993 }
  0xc3   : > { %v1324_v32 = vsel %vm1303_vm6, %v2165_v28, %v994_v11 }
  0xc5   : > { %1147 = vrot.lane.b32.xlu2 %v3749_v42, %s2374_s8 }
  0xc6   : > { %1238 = vrot.lane.b32.xlu0 %v3750_v49, %s2376_s10  ;;  %v1064_v35 = vpop.permute.xlu2 %1063 }
  0xc7   : > { %1112 = vrot.lane.b32.xlu1 %v3035_v44, %s2375_s9  ;;  %v3045_v56 = vsel %vm1352_vm7, %v1309_v19, %v1064_v35  ;;  %v3752_v19 = vld [vmem:[#allocation16_spill] sm:$0xff] }
  0xca   : > { %v1002_v62 = vpop.permute.xlu1 %1001 }
  0xcb   : > { %v1336_v9 = vsel %vm1303_vm6, %v2169_v36, %v1002_v62 }
  0xcd   : > { %1252 = vrot.lane.b32.xlu2 %v3751_v41, %s2376_s10 }
  0xce   : > { %1279 = vrot.lane.b32.xlu0 %v2898_v47, %s2379_s13 }
  0xcf   : > { %1217 = vrot.lane.b32.xlu1 %v2169_v36, %s2377_s11  ;;  %v1070_v39 = vpop.permute.xlu2 %1069 }
  0xd0   : > { %v3060_v51 = vsel %vm1352_vm7, %v1318_v55, %v1070_v39  ;;  %v1000_v17 = vpop.permute.xlu0 %999 }
  0xd5   : > { %1106 = vrot.lane.b32.xlu2 %v2165_v28, %s2375_s9 }
  0xd6   : > { %1182 = vrot.lane.b32.xlu0 %v2936_v14, %s2378_s12 }
  0xd7   : > { %1100 = vrot.lane.b32.xlu1 %v2162_v23, %s2375_s9  ;;  %v1076_v38 = vpop.permute.xlu2 %1075 }
  0xd8   : > { %v3072_v53 = vsel %vm1352_vm7, %v1327_v10, %v1076_v38  ;;  %v1333_v10 = vsel %vm1303_vm6, %v3035_v44, %v1000_v17  ;;  %v2177_v17 = vld [vmem:[%s3691_s1] sm:$0xff] }
  0xd9   : > { %v1008_v48 = vpop.permute.xlu1 %1007 }
  0xdd   : > { %1170 = vrot.lane.b32.xlu2 %v2866_v15, %s2378_s12  ;;  %v1345_v15 = vsel %vm1303_vm6, %v3086_v0, %v1008_v48 }
  0xde   : > { %1287 = vrot.lane.b32.xlu0 %v2924_v8, %s2379_s13  ;;  %v1006_v37 = vpop.permute.xlu0 %1005 }
  0xdf   : > { %1141 = vrot.lane.b32.xlu1 %v3748_v59, %s2374_s8  ;;  %v1082_v20 = vpop.permute.xlu2 %1081 }
  0xe0   : > { %v3081_v45 = vsel %vm1352_vm7, %v1336_v9, %v1082_v20  ;;  %v3753_v9 = vld [vmem:[#allocation9_spill] sm:$0xff] }
  0xe1   : > { %v3083_v29 = vpop.permute.xlu1 %1061 }
  0xe5   : > { %1211 = vrot.lane.b32.xlu2 %v3063_v3, %s2377_s11 }
  0xe6   : > { %1135 = vrot.lane.b32.xlu0 %v3750_v49, %s2374_s8 }
  0xe7   : > { %1205 = vrot.lane.b32.xlu1 %v3049_v13, %s2377_s11  ;;  %v1088_v58 = vpop.permute.xlu2 %1087 }
  0xe8   : > { %v3096_v23 = vpop.permute.xlu0 %1011  ;;  %v3099_v12 = vsel %vm1352_vm7, %v1345_v15, %v1088_v58  ;;  %v3147_v15 = vld [vmem:[%s2461_s5 + $0x90] sm:$0xff] }
  0xe9   : > { %v1068_v28 = vpop.permute.xlu1 %1067 }
  0xea   : > { %v3102_v5 = vsel %vm1352_vm7, %v1315_v24, %v1068_v28  ;;  %v1587_v24 = vld [vmem:[%s3691_s1 + $0x10] sm:$0x3] }
  0xeb   : > { %v1597_v62 = vunpack.c.l.b16 %v1587_v24 }
  0xed   : > { %1275 = vrot.lane.b32.xlu2 %v2857_v61, %s2379_s13 }
  0xee   : > { %1176 = vrot.lane.b32.xlu0 %v2898_v47, %s2378_s12  ;;  %v1600_v47 = vpack.c.b16 %v1597_v62, %v1597_v62 }
  0xef   : > { %1246 = vrot.lane.b32.xlu1 %v3752_v19, %s2376_s10  ;;  %v3110_v59 = vpop.permute.xlu2 %1131 }
  0xf0   : > { %v1066_v7 = vpop.permute.xlu0 %1065 }
  0xf1   : > { %v3114_v11 = vsel %vm1352_vm7, %v2999_v6, %v1066_v7  ;;  %v1074_v49 = vpop.permute.xlu1 %1073  ;;  %v1638_v6 = vsel %vm1636_vm8, %v1600_v47, 0  ;;  %v1342_v7 = vsel %vm1303_vm6, %v3147_v15, %v1006_v37  ;;  %v2173_v47 = vld [vmem:[%s2461_s5 + $0xa8] sm:$0xff] }
  0xf2   : > { %v3120_v35 = vsel %vm1352_vm7, %v1324_v32, %v1074_v49  ;;  %1645 = vmatpush.bf16.msra.mxu0 %v1638_v6  ;;  %v1321_v32 = vsel %vm1303_vm6, %v2996_v22, %v2992_v1  ;;  %2180 = vmatpush.bf16.msra.mxu1 %v1638_v6  ;;  %v3144_v1 = vld [vmem:[%s2461_s5 + $0x60] sm:$0xff] }
  0xf3   : > { %2181 = vmatpush.bf16.msra.mxu2 %v1638_v6  ;;  %2182 = vmatpush.bf16.msra.mxu3 %v1638_v6  ;;  %v3173_v6 = vld [vmem:[%s2461_s5 + $0x84] sm:$0xff] }
  0xf4   : > { %v1339_v37 = vsel %vm1303_vm6, %v3173_v6, %v3019_v33  ;;  %v1348_v33 = vsel %vm1303_vm6, %v2173_v47, %v3026_v57 }
  0xf5   : > { %1120 = vrot.lane.b32.xlu2 %v3086_v0, %s2375_s9 }
  0xf6   : > { %1240 = vrot.lane.b32.xlu0 %v3753_v9, %s2376_s10 }
  0xf7   : > { %1114 = vrot.lane.b32.xlu1 %v2169_v36, %s2375_s9  ;;  %v3127_v55 = vpop.permute.xlu2 %1236  ;;  %v2178_v36 = vld [vmem:[%s3691_s1 + $0x8] sm:$0xff] }
  0xf8   : > { %v1072_v39 = vpop.permute.xlu0 %1071  ;;  %1646 = vmatpush.bf16.msra.mxu0 %v2178_v36  ;;  %2183 = vmatpush.bf16.msra.mxu1 %v2178_v36 }
  0xf9   : > { %v3135_v38 = vsel %vm1352_vm7, %v1321_v32, %v1072_v39  ;;  %v1080_v48 = vpop.permute.xlu1 %1079  ;;  %2184 = vmatpush.bf16.msra.mxu2 %v2178_v36  ;;  %2185 = vmatpush.bf16.msra.mxu3 %v2178_v36 }
  0xfa   : > { %v3141_v20 = vsel %vm1352_vm7, %v1333_v10, %v1080_v48  ;;  %v2159_v48 = vld [vmem:[%s2461_s5] sm:$0xff] }
  0xfc   : > { %1647 = vmatpush.bf16.msra.mxu0 %v2177_v17  ;;  %2186 = vmatpush.bf16.msra.mxu1 %v2177_v17 }
  0xfd   : > { %1184 = vrot.lane.b32.xlu2 %v2924_v8, %s2378_s12  ;;  %v1330_v8 = vsel %vm1303_vm6, %v3144_v1, %v3006_v2  ;;  %2187 = vmatpush.bf16.msra.mxu2 %v2177_v17 }
  0xfe   : > { %1281 = vrot.lane.b32.xlu0 %v2894_v40, %s2379_s13  ;;  %2188 = vmatpush.bf16.msra.mxu3 %v2177_v17 }
  0xff   : > { %1155 = vrot.lane.b32.xlu1 %v2795_v27, %s2374_s8  ;;  %v3158_v58 = vpop.permute.xlu2 %1104 }
 0x100   : > { %v1078_v28 = vpop.permute.xlu0 %1077 }
 0x101   : > { %v3166_v49 = vsel %vm1352_vm7, %v1330_v8, %v1078_v28  ;;  %v1086_v24 = vpop.permute.xlu1 %1085  ;;  %v1306_v28 = vsel %vm1303_vm6, %v2159_v48, %v3008_v63 }
 0x102   : > { %v3169_v62 = vsel %vm1352_vm7, %v1342_v7, %v1086_v24  ;;  %v1354_v7 = vsel %vm1352_vm7, %v1306_v28, %v3083_v29 }
 0x105   : > { %1225 = vrot.lane.b32.xlu2 %v2173_v47, %s2377_s11 }
 0x106   : > { %1149 = vrot.lane.b32.xlu0 %v3751_v41, %s2374_s8 }
 0x107   : > { %1219 = vrot.lane.b32.xlu1 %v3173_v6, %s2377_s11  ;;  %v1169_v2 = vpop.permute.xlu2 %1168 }
 0x108   : > { %v1084_v32 = vpop.permute.xlu0 %1083 }
 0x109   : > { %v3184_v39 = vsel %vm1352_vm7, %v1339_v37, %v1084_v32  ;;  %v1097_v10 = vpop.permute.xlu1 %1096  ;;  %v3754_v37 = vld [vmem:[#allocation19_spill] sm:$0xff] }
 0x10a   : > { %v1387_v24 = vsel %vm1385_vm9, %v1354_v7, %v1097_v10 }
 0x10b   : > { %v1420_v63 = vsel %vm1418_vm10, %v1387_v24, %v3110_v59 }
 0x10d   : > { %1289 = vrot.lane.b32.xlu2 %v2973_v18, %s2379_s13 }
 0x10e   : > { %1190 = vrot.lane.b32.xlu0 %v2959_v60, %s2378_s12 }
 0x10f   : > { %1260 = vrot.lane.b32.xlu1 %v2776_v46, %s2376_s10  ;;  %v3192_v41 = vpop.permute.xlu2 %1209 }
 0x110   : > { %v1090_v36 = vpop.permute.xlu0 %1089 }
 0x111   : > { %v3198_v17 = vsel %vm1352_vm7, %v1348_v33, %v1090_v36  ;;  %v1202_v8 = vpop.permute.xlu1 %1201 }
 0x115   : > { %1108 = vrot.lane.b32.xlu2 %v3063_v3, %s2375_s9 }
 0x116   : > { %1254 = vrot.lane.b32.xlu0 %v3754_v37, %s2376_s10 }
 0x117   : > { %1102 = vrot.lane.b32.xlu1 %v3049_v13, %s2375_s9  ;;  %v1274_v57 = vpop.permute.xlu2 %1273 }
 0x118   : > { %v1167_v32 = vpop.permute.xlu0 %1166 }
 0x119   : > { %v1099_v29 = vpop.permute.xlu1 %1098  ;;  %v1453_v48 = vsel %vm1451_vm11, %v1420_v63, %v1167_v32 }
 0x11a   : > { %v1486_v3 = vsel %vm1484_vm12, %v1453_v48, %v1202_v8 }
 0x11b   : > { %v1519_v10 = vsel %vm1517_vm13, %v1486_v3, %v3127_v55  ;;  %v3755_v55 = vld [vmem:[#allocation14_spill] sm:$0xff] }
 0x11d   : > { %1172 = vrot.lane.b32.xlu2 %v2857_v61, %s2378_s12 }
 0x11e   : > { %1295 = vrot.lane.b32.xlu0 %v2977_v21, %s2379_s13 }
 0x11f   : > { %1143 = vrot.lane.b32.xlu1 %v3752_v19, %s2374_s8  ;;  %v1148_v13 = vpop.permute.xlu2 %1147 }
 0x120   : > { %v1272_v59 = vpop.permute.xlu0 %1271 }
 0x121   : > { %v1552_v33 = vsel %vm1550_vm14, %v1519_v10, %v1272_v59  ;;  %v1140_v36 = vpop.permute.xlu1 %1139 }
 0x122   : > { %2138 = vmatmul.msk.bf16.vlgmr.msra.gmra.mxu0 %vm1603_vm15, %v1552_v33 }
 0x125   : > { %1213 = vrot.lane.b32.xlu2 %v3144_v1, %s2377_s11 }
 0x126   : > { %1137 = vrot.lane.b32.xlu0 %v3753_v9, %s2374_s8  ;;  %v1389_v9 = vsel %vm1385_vm9, %v3045_v56, %v1099_v29 }
 0x127   : > { %1207 = vrot.lane.b32.xlu1 %v2996_v22, %s2377_s11  ;;  %v1253_v61 = vpop.permute.xlu2 %1252 }
 0x128   : > { %v1134_v19 = vpop.permute.xlu0 %1133 }
 0x129   : > { %v1204_v8 = vpop.permute.xlu1 %1203  ;;  %v1422_v22 = vsel %vm1418_vm10, %v1389_v9, %v1134_v19 }
 0x12d   : > { %1277 = vrot.lane.b32.xlu2 %v2922_v52, %s2379_s13  ;;  %v1455_v52 = vsel %vm1451_vm11, %v1422_v22, %v1169_v2 }
 0x12e   : > { %1178 = vrot.lane.b32.xlu0 %v2894_v40, %s2378_s12  ;;  %v1488_v32 = vsel %vm1484_vm12, %v1455_v52, %v1204_v8  ;;  %v812_v8 = vrot.slane %v2807_v43, 5 }
 0x12f   : > { %1248 = vrot.lane.b32.xlu1 %v3755_v55, %s2376_s10  ;;  %v3237_v28 = vpop.permute.xlu2 %1106 }
 0x130   : > { %v1175_v7 = vpop.permute.xlu0 %1174 }
 0x131   : > { %v1245_v24 = vpop.permute.xlu1 %1244 }
 0x135   : > { %1122 = vrot.lane.b32.xlu2 %v2173_v47, %s2375_s9  ;;  %v1395_v47 = vsel %vm1385_vm9, %v3060_v51, %v3158_v58 }
 0x136   : > { %1242 = vrot.lane.b32.xlu0 %v3747_v30, %s2376_s10  ;;  %v1428_v2 = vsel %vm1418_vm10, %v1395_v47, %v1140_v36 }
 0x137   : > { %1116 = vrot.lane.b32.xlu1 %v3173_v6, %s2375_s9  ;;  %v3248_v40 = vpop.permute.xlu2 %1170  ;;  %v1461_v6 = vsel %vm1451_vm11, %v1428_v2, %v1175_v7 }
 0x138   : > { %v1239_v63 = vpop.permute.xlu0 %1238  ;;  %v1494_v29 = vsel %vm1484_vm12, %v1461_v6, %v3192_v41 }
 0x139   : > { %v1521_v48 = vsel %vm1517_vm13, %v1488_v32, %v1239_v63  ;;  %v1113_v56 = vpop.permute.xlu1 %1112  ;;  %v1527_v58 = vsel %vm1517_vm13, %v1494_v29, %v1245_v24  ;;  %v815_v24 = vrot.slane %v2816_v31, 5 }
 0x13a   : > { %v1554_v30 = vsel %vm1550_vm14, %v1521_v48, %v1274_v57  ;;  %v1403_v41 = vsel %vm1385_vm9, %v3166_v49, %v1113_v56 }
 0x13b   : > { %2139 = vmatmul.msk.bf16.gmra.mxu0 %vm1603_vm15, %v1554_v30  ;;  %v1436_v33 = vsel %vm1418_vm10, %v1403_v41, %v1148_v13  ;;  %v814_v13 = vrot.slane %v812_v8, 4  ;;  %v3321_v30 = vld [vmem:[%s2461_s5 + $0xc0] sm:$0xf] }
 0x13d   : > { %1186 = vrot.lane.b32.xlu2 %v2973_v18, %s2378_s12  ;;  %v3273_v18 = vld [vmem:[%s2461_s5 + $0xb4] sm:$0xff]  ;;  %v816_v32 = vsel %vm2786_vm5, %v814_v13, %v815_v24 }
 0x13e   : > { %1283 = vrot.lane.b32.xlu0 %v2963_v25, %s2379_s13  ;;  %v1044_v31 = vunpack.c.l.b16 %v816_v32 }
 0x13f   : > { %1157 = vrot.lane.b32.xlu1 %v2776_v46, %s2374_s8  ;;  %v3267_v51 = vpop.permute.xlu2 %1211 }
 0x140   : > { %v1280_v57 = vpop.permute.xlu0 %1279 }
 0x141   : > { %v1560_v3 = vsel %vm1550_vm14, %v1527_v58, %v1280_v57  ;;  %v1218_v59 = vpop.permute.xlu1 %1217  ;;  %v821_v58 = vshll.u32 %v3321_v30, 16 }
 0x142   : > { %2142 = vmatmul.msk.bf16.vlgmr.msra.gmra.mxu1 %vm1603_vm15, %v1560_v3 }
 0x145   : > { %1227 = vrot.lane.b32.xlu2 %v3273_v18, %s2377_s11 }
 0x146   : > { %1151 = vrot.lane.b32.xlu0 %v3754_v37, %s2374_s8  ;;  %v2055_v37 = vrot.slane %v2800_v34, 9 }
 0x147   : > { %1221 = vrot.lane.b32.xlu1 %v3147_v15, %s2377_s11  ;;  %v1276_v46 = vpop.permute.xlu2 %1275 }
 0x148   : > { %v1183_v10 = vpop.permute.xlu0 %1182 }
 0x149   : > { %v1101_v36 = vpop.permute.xlu1 %1100  ;;  %v1469_v19 = vsel %vm1451_vm11, %v1436_v33, %v1183_v10  ;;  %v823_v10 = vrot.slane %v821_v58, 5 }
 0x14a   : > { %v1502_v7 = vsel %vm1484_vm12, %v1469_v19, %v1218_v59  ;;  %v1391_v2 = vsel %vm1385_vm9, %v3114_v11, %v1101_v36 }
 0x14b   : > { %v1535_v43 = vsel %vm1517_vm13, %v1502_v7, %v1253_v61  ;;  %v263_v7 = vld [vmem:[%s2461_s5 + $0xc8] sm:$0x1] }
 0x14d   : > { %1291 = vrot.lane.b32.xlu2 %v2967_v4, %s2379_s13 }
 0x14e   : > { %1192 = vrot.lane.b32.xlu0 %v2977_v21, %s2378_s12  ;;  %v813_v21 = vsel %vm2786_vm5, %v2055_v37, %v812_v8 }
 0x14f   : > { %1262 = vrot.lane.b32.xlu1 %v2859_v16, %s2376_s10  ;;  %v3293_v49 = vpop.permute.xlu2 %1120  ;;  %v1043_v34 = vunpack.c.l.b16 %v813_v21 }
 0x150   : > { %v1288_v9 = vpop.permute.xlu0 %1287 }
 0x151   : > { %v1568_v22 = vsel %vm1550_vm14, %v1535_v43, %v1288_v9  ;;  %v1142_v52 = vpop.permute.xlu1 %1141  ;;  %v3312_v56 = vpack.c.b16 %v1044_v31, %v1043_v34  ;;  %v837_v9 = vshll.u32 %v263_v7, 16 }
 0x152   : > { %2146 = vmatmul.msk.bf16.vlgmr.msra.gmra.mxu2 %vm1603_vm15, %v1568_v22 }
 0x153   : > { %v839_v21 = vrot.slane %v837_v9, 5 }
 0x155   : > { %1145 = vrot.lane.b32.xlu2 %v3755_v55, %s2374_s8 }
 0x156   : > { %1256 = vrot.lane.b32.xlu0 %v2824_v54, %s2376_s10 }
 0x157   : > { %1110 = vrot.lane.b32.xlu1 %v3144_v1, %s2375_s9  ;;  %v3310_v63 = vpop.permute.xlu2 %1184  ;;  %v3324_v1 = vld [vmem:[%s2461_s5 + $0xc4] sm:$0xf] }
 0x158   : > { %v1136_v61 = vpop.permute.xlu0 %1135  ;;  %v831_v57 = vshrl.u32 %v3324_v1, 16 }
 0x159   : > { %v1206_v48 = vpop.permute.xlu1 %1205  ;;  %v1424_v6 = vsel %vm1418_vm10, %v1391_v2, %v1136_v61  ;;  %v846_v2 = vrot.slane %v3324_v1, 5 }
 0x15a   : > { %v1457_v3 = vsel %vm1451_vm11, %v1424_v6, %v3248_v40  ;;  %v833_v36 = vrot.slane %v831_v57, 4  ;;  %v1397_v40 = vsel %vm1385_vm9, %v3135_v38, %v3237_v28  ;;  %v849_v6 = vrot.slane %v263_v7, 5 }
 0x15b   : > { %v1490_v11 = vsel %vm1484_vm12, %v1457_v3, %v1206_v48  ;;  %v1430_v37 = vsel %vm1418_vm10, %v1397_v40, %v1142_v52 }
 0x15d   : > { %1250 = vrot.lane.b32.xlu2 %v3749_v42, %s2376_s10  ;;  %v818_v42 = vshrl.u32 %v3321_v30, 16 }
 0x15e   : > { %1297 = vrot.lane.b32.xlu0 %v3312_v56, %s2379_s13 }
 0x15f   : > { %1215 = vrot.lane.b32.xlu1 %v3035_v44, %s2377_s11  ;;  %v3329_v29 = vpop.permute.xlu2 %1225  ;;  %v827_v44 = vshll.u32 %v3324_v1, 16  ;;  %v820_v41 = vrot.slane %v818_v42, 4  ;;  %v264_v42 = vld [vmem:[%s2461_s5 + $0xcc] sm:$0xf] }
 0x160   : > { %v1177_v55 = vpop.permute.xlu0 %1176 }
 0x161   : > { %v1247_v47 = vpop.permute.xlu1 %1246  ;;  %v829_v33 = vrot.slane %v827_v44, 5  ;;  %v824_v13 = vor.u32 %v823_v10, %v820_v41  ;;  %v265_v44 = vld [vmem:[%s2461_s5 + $0xd0] sm:$0xf] }
 0x162   : > { %v861_v10 = vshll.u32 %v265_v44, 16 }
 0x163   : > { %v834_v24 = vor.u32 %v833_v36, %v829_v33  ;;  %v825_v22 = vrot.slane %v824_v13, 4  ;;  %v880_v36 = vrot.slane %v265_v44, 5 }
 0x165   : > { %1124 = vrot.lane.b32.xlu2 %v3273_v18, %s2375_s9  ;;  %v835_v52 = vrot.slane %v834_v24, 4  ;;  %v882_v9 = vrot.slane %v880_v36, 4 }
 0x166   : > { %1180 = vrot.lane.b32.xlu0 %v2963_v25, %s2378_s12 }
 0x167   : > { %1118 = vrot.lane.b32.xlu1 %v3147_v15, %s2375_s9  ;;  %v1463_v15 = vsel %vm1451_vm11, %v1430_v37, %v1177_v55  ;;  %v3353_v43 = vpop.permute.xlu2 %1289 }
 0x168   : > { %v1241_v59 = vpop.permute.xlu0 %1240  ;;  %v1496_v38 = vsel %vm1484_vm12, %v1463_v15, %v3267_v51  ;;  %v2175_v51 = vld [vmem:[%s2461_s5 + $0xc0] sm:$0xff] }
 0x169   : > { %v1523_v19 = vsel %vm1517_vm13, %v1490_v11, %v1241_v59  ;;  %v1115_v8 = vpop.permute.xlu1 %1114  ;;  %v1529_v28 = vsel %vm1517_vm13, %v1496_v38, %v1247_v47  ;;  %v852_v11 = vshrl.u32 %v264_v42, 16 }
 0x16a   : > { %v1556_v25 = vsel %vm1550_vm14, %v1523_v19, %v1276_v46  ;;  %v1405_v59 = vsel %vm1385_vm9, %v3141_v20, %v1115_v8  ;;  %v266_v20 = vld [vmem:[%s2461_s5 + $0xd4] sm:$0x1]  ;;  %v863_v8 = vrot.slane %v861_v10, 5 }
 0x16b   : > { %2140 = vmatmul.msk.bf16.gmra.mxu0 %vm1603_vm15, %v1556_v25  ;;  %v854_v40 = vrot.slane %v852_v11, 4  ;;  %v883_v38 = vrot.slane %v266_v20, 5 }
 0x16d   : > { %1188 = vrot.lane.b32.xlu2 %v2967_v4, %s2378_s12  ;;  %v840_v4 = vsel %vm2499_vm2, %v835_v52, %v839_v21  ;;  %v871_v21 = vshll.u32 %v266_v20, 16 }
 0x16e   : > { %1285 = vrot.lane.b32.xlu0 %v2936_v14, %s2379_s13  ;;  %v830_v14 = vsel %vm2499_vm2, %v825_v22, %v829_v33  ;;  %v1129_v61 = vunpack.c.l.b16 %v840_v4  ;;  %v865_v33 = vshrl.u32 %v265_v44, 16 }
 0x16f   : > { %1159 = vrot.lane.b32.xlu1 %v2859_v16, %s2374_s8  ;;  %v3373_v16 = vpop.permute.xlu2 %1108  ;;  %v1128_v31 = vunpack.c.l.b16 %v830_v14 }
 0x170   : > { %v1282_v46 = vpop.permute.xlu0 %1281  ;;  %v867_v15 = vrot.slane %v865_v33, 4 }
 0x171   : > { %v1562_v32 = vsel %vm1550_vm14, %v1529_v28, %v1282_v46  ;;  %v1156_v34 = vpop.permute.xlu1 %1155  ;;  %v3378_v47 = vpack.c.b16 %v1129_v61, %v1128_v31  ;;  %v1411_v28 = vsel %vm1385_vm9, %v3169_v62, %v3293_v49  ;;  %v884_v49 = vsel %vm2786_vm5, %v882_v9, %v883_v38 }
 0x172   : > { %2143 = vmatmul.msk.bf16.gmra.mxu1 %vm1603_vm15, %v1562_v32  ;;  %v1444_v32 = vsel %vm1418_vm10, %v1411_v28, %v1156_v34  ;;  %v868_v4 = vor.u32 %v867_v15, %v863_v8  ;;  %v873_v61 = vrot.slane %v871_v21, 5 }
 0x175   : > { %1229 = vrot.lane.b32.xlu2 %v2175_v51, %s2377_s11 }
 0x176   : > { %1153 = vrot.lane.b32.xlu0 %v2824_v54, %s2374_s8  ;;  %v2056_v54 = vrot.slane %v3321_v30, 9  ;;  %v855_v30 = vshll.u32 %v264_v42, 16 }
 0x177   : > { %1223 = vrot.lane.b32.xlu1 %v3086_v0, %s2377_s11  ;;  %v848_v0 = vrot.slane %v846_v2, 4  ;;  %v3390_v57 = vpop.permute.xlu2 %1172 }
 0x178   : > { %v1150_v48 = vpop.permute.xlu0 %1149  ;;  %v847_v1 = vsel %vm2786_vm5, %v2056_v54, %v846_v2  ;;  %v857_v25 = vrot.slane %v855_v30, 5  ;;  %v1269_v2 = vunpack.c.l.b16 %v884_v49 }
 0x179   : > { %v1220_v55 = vpop.permute.xlu1 %1219  ;;  %v850_v41 = vsel %vm2786_vm5, %v848_v0, %v849_v6  ;;  %v1163_v19 = vunpack.c.l.b16 %v847_v1 }
 0x17a   : > { %v1164_v7 = vunpack.c.l.b16 %v850_v41  ;;  %v858_v52 = vor.u32 %v857_v25, %v854_v40 }
 0x17c   : > { %v1165_v22 = vpack.c.b16 %v1164_v7, %v1163_v19 }
 0x17d   : > { %1293 = vrot.lane.b32.xlu2 %v2959_v60, %s2379_s13  ;;  %v1438_v60 = vsel %vm1418_vm10, %v1405_v59, %v1150_v48  ;;  %v869_v48 = vrot.slane %v868_v4, 4 }
 0x17e   : > { %1194 = vrot.lane.b32.xlu0 %v3312_v56, %s2378_s12  ;;  %v1471_v37 = vsel %vm1451_vm11, %v1438_v60, %v3310_v63 }
 0x17f   : > { %1264 = vrot.lane.b32.xlu1 %v3378_v47, %s2376_s10  ;;  %v1504_v13 = vsel %vm1484_vm12, %v1471_v37, %v1220_v55  ;;  %v1214_v14 = vpop.permute.xlu2 %1213 }
 0x180   : > { %v1191_v58 = vpop.permute.xlu0 %1190 }
 0x181   : > { %v1261_v3 = vpop.permute.xlu1 %1260  ;;  %v1477_v31 = vsel %vm1451_vm11, %v1444_v32, %v1191_v58 }
 0x182   : > { %v1510_v34 = vsel %vm1484_vm12, %v1477_v31, %v3329_v29  ;;  %v874_v29 = vsel %vm2499_vm2, %v869_v48, %v873_v61 }
 0x183   : > { %v1543_v54 = vsel %vm1517_vm13, %v1510_v34, %v1261_v3  ;;  %v1234_v11 = vunpack.c.l.b16 %v874_v29 }
 0x185   : > { %1126 = vrot.lane.b32.xlu2 %v2175_v51, %s2375_s9  ;;  %v2176_v51 = vld [vmem:[%s2461_s5 + $0xcc] sm:$0xff]  ;;  %s2038_s5 = sshll.u32 %s3438_s30, 8 }
 0x186   : > { %1258 = vrot.lane.b32.xlu0 %v2795_v27, %s2376_s10  ;;  %v2057_v27 = vrot.slane %v264_v42, 9  ;;  %s3442_s6 = scalar_lea.vmem [#allocation2], %s2038_s5 }
 0x187   : > { %1091 = vrot.lane.b32.xlu1 %v3312_v56, %s2373_s7  ;;  %v1278_v44 = vpop.permute.xlu2 %1277 }
 0x188   : > { %v1255_v24 = vpop.permute.xlu0 %1254  ;;  %v881_v62 = vsel %vm2786_vm5, %v2057_v27, %v880_v36 }
 0x189   : > { %v1537_v63 = vsel %vm1517_vm13, %v1504_v13, %v1255_v24  ;;  %v1103_v46 = vpop.permute.xlu1 %1102  ;;  %v1268_v55 = vunpack.c.l.b16 %v881_v62 }
 0x18a   : > { %v1570_v56 = vsel %vm1550_vm14, %v1537_v63, %v3353_v43  ;;  %v859_v43 = vrot.slane %v858_v52, 4  ;;  %v1393_v33 = vsel %vm1385_vm9, %v3102_v5, %v1103_v46  ;;  %v1399_v5 = vsel %vm1385_vm9, %v3120_v35, %v3373_v16 }
 0x18b   : > { %2147 = vmatmul.msk.bf16.gmra.mxu2 %vm1603_vm15, %v1570_v56  ;;  %v1270_v58 = vpack.c.b16 %v1269_v2, %v1268_v55 }
 0x18c   : > { %v864_v42 = vsel %vm2499_vm2, %v859_v43, %v863_v8 }
 0x18d   : > { %1231 = vrot.lane.b32.xlu2 %v2176_v51, %s2377_s11  ;;  %v1233_v1 = vunpack.c.l.b16 %v864_v42 }
 0x18e   : > { %1299 = vrot.lane.b32.xlu0 %v1165_v22, %s2379_s13 }
 0x18f   : > { %1196 = vrot.lane.b32.xlu1 %v1165_v22, %s2378_s12  ;;  %v1235_v59 = vpack.c.b16 %v1234_v11, %v1233_v1  ;;  %v1123_v26 = vpop.permute.xlu2 %1122  ;;  %s1890_s12 = sshll.u32 %s3442_s6, 4  ;;  %s1891_s12 = int_to_ptr.vmem [resolvable:$true] %s1890_s12 }
 0x190   : > { %v1296_v0 = vpop.permute.xlu0 %1295 }
 0x191   : > { %v1576_v50 = vsel %vm1550_vm14, %v1543_v54, %v1296_v0  ;;  %v1144_v6 = vpop.permute.xlu1 %1143 }
 0x192   : > { %2150 = vmatmul.msk.bf16.vlgmr.msra.gmra.mxu3 %vm1603_vm15, %v1576_v50  ;;  %v1432_v27 = vsel %vm1418_vm10, %v1399_v5, %v1144_v6 }
 0x196   : > { %1161 = vrot.lane.b32.xlu0 %v3378_v47, %s2374_s8  ;;  %s2179_s8 = sshll.u32 %s2427_s19, 8 }
 0x197   : > { %1301 = vrot.lane.b32.xlu1 %v1270_v58, %s2379_s13  ;;  %v1187_v8 = vpop.permute.xlu2 %1186  ;;  %s1889_s11 = scalar_lea.hbm %s3692_s2, %s2179_s8 }
 0x198   : > { %v1138_v3 = vpop.permute.xlu0 %1137  ;;  %s1892_s13 = sshll.u32 %s1889_s11, 4  ;;  %s1893_s13 = int_to_ptr.hbm [resolvable:$true] %s1892_s13 }
 0x199   : > { %v1208_v30 = vpop.permute.xlu1 %1207  ;;  %v1426_v60 = vsel %vm1418_vm10, %v1393_v33, %v1138_v3  ;;  %s2262_s22 = sshra.s32 %s1893_s13, 4  ;;  %s2263_s22 = int_to_ptr.hbm [resolvable:$true] %s2262_s22 }
 0x19a   : > { %v1459_v36 = vsel %vm1451_vm11, %v1426_v60, %v3390_v57  ;;  %s2264_s23 = scalar_lea.hbm %s2263_s22, 256  ;;  %p2269_p0 = scmp.lt.s32.totalorder %s2263_s22, %s3692_s2 }
 0x19b   : > { %v1492_v40 = vsel %vm1484_vm12, %v1459_v36, %v1208_v30  ;;  %p2265_p11 = scmp.ne.s32.totalorder %s2263_s22, %s2264_s23  ;;  %p2270_p1 = scmp.lt.s32.totalorder %s2268_s29, %s2264_s23 }
 0x19d   : > { %p2266_p12 = pnand %p2265_p11, %p2446_p5  ;;  %p2271_p2 = por %p2270_p1, %p2269_p0 }
 0x19e   : > { %1266 = vrot.lane.b32.xlu0 %v1235_v59, %s2376_s10 }
 0x19f   : > { %v1649_v41 = vpop.f32.mrf.mxu0  ;;  %v1228_v35 = vpop.permute.xlu2 %1227  ;;  %p2267_p13 = pneg %p2266_p12 }
 0x1a0   : > { %1729 = vst [vmem:[%s3442_s6] sm:$0xff] %v1649_v41  ;;  %v1179_v47 = vpop.permute.xlu0 %1178  ;;  %v1799_v7 = vmul.f32 %v1649_v41, %v1649_v41 }
 0x1a1   : > { %v1249_v10 = vpop.permute.xlu1 %1248  ;;  %v1465_v9 = vsel %vm1451_vm11, %v1432_v27, %v1179_v47  ;;  %p2272_p3 = pnand %p2271_p2, %p2267_p13 }
 0x1a2   : > { %v1498_v38 = vsel %vm1484_vm12, %v1465_v9, %v1214_v14 }
 0x1a3   : > { %v1531_v28 = vsel %vm1517_vm13, %v1498_v38, %v1249_v10 }
 0x1a7   : > { %v1651_v19 = vpop.f32.mrf.mxu0  ;;  %v1292_v51 = vpop.permute.xlu2 %1291 }
 0x1a8   : > { %1730 = vst [vmem:[%s3442_s6 + $0x8] sm:$0xff] %v1651_v19  ;;  %v1761_v25 = vadd.f32 %v1651_v19, %v1649_v41  ;;  %v1800_v37 = vmul.f32 %v1651_v19, %v1651_v19  ;;  %v1243_v20 = vpop.permute.xlu0 %1242 }
 0x1a9   : > { %v1525_v15 = vsel %vm1517_vm13, %v1492_v40, %v1243_v20  ;;  %v1117_v13 = vpop.permute.xlu1 %1116 }
 0x1aa   : > { %v1831_v24 = vadd.f32 %v1800_v37, %v1799_v7  ;;  %v1558_v57 = vsel %vm1550_vm14, %v1525_v15, %v1278_v44  ;;  %v1407_v34 = vsel %vm1385_vm9, %v3081_v45, %v1117_v13  ;;  %v1413_v45 = vsel %vm1385_vm9, %v3099_v12, %v1123_v26 }
 0x1ab   : > { %2141 = vmatmul.msk.bf16.gmra.mxu0 %vm1603_vm15, %v1558_v57 }
 0x1af   : > { %v1146_v2 = vpop.permute.xlu2 %1145 }
 0x1b0   : > { %v1284_v63 = vpop.permute.xlu0 %1283 }
 0x1b1   : > { %v1564_v46 = vsel %vm1550_vm14, %v1531_v28, %v1284_v63  ;;  %v1158_v56 = vpop.permute.xlu1 %1157 }
 0x1b2   : > { %2144 = vmatmul.msk.bf16.gmra.mxu1 %vm1603_vm15, %v1564_v46  ;;  %v1446_v44 = vsel %vm1418_vm10, %v1413_v45, %v1158_v56 }
 0x1b7   : > { %v1251_v59 = vpop.permute.xlu2 %1250 }
 0x1b8   : > { %v1654_v16 = vpop.f32.mrf.mxu0  ;;  %v1152_v22 = vpop.permute.xlu0 %1151 }
 0x1b9   : > { %1731 = vst [vmem:[%s3442_s6 + $0x10] sm:$0xff] %v1654_v16  ;;  %v1762_v52 = vadd.f32 %v1761_v25, %v1654_v16  ;;  %v1801_v21 = vmul.f32 %v1654_v16, %v1654_v16  ;;  %v1222_v32 = vpop.permute.xlu1 %1221  ;;  %v1440_v55 = vsel %vm1418_vm10, %v1407_v34, %v1152_v22 }
 0x1ba   : > { %v1473_v54 = vsel %vm1451_vm11, %v1440_v55, %v1187_v8 }
 0x1bb   : > { %v1832_v4 = vadd.f32 %v1831_v24, %v1801_v21  ;;  %v1506_v50 = vsel %vm1484_vm12, %v1473_v54, %v1222_v32 }
 0x1bf   : > { %v3465_v14 = vpop.f32.mrf.mxu1  ;;  %v1125_v19 = vpop.permute.xlu2 %1124 }
 0x1c0   : > { %1737 = vst [vmem:[%s3442_s6 + $0x40] sm:$0xff] %v3465_v14  ;;  %v1656_v31 = vpop.f32.mrf.mxu0  ;;  %v1193_v62 = vpop.permute.xlu0 %1192 }
 0x1c1   : > { %1732 = vst [vmem:[%s3442_s6 + $0x18] sm:$0xff] %v1656_v31  ;;  %v1763_v49 = vadd.f32 %v1762_v52, %v1656_v31  ;;  %v1802_v43 = vmul.f32 %v1656_v31, %v1656_v31  ;;  %v1263_v61 = vpop.permute.xlu1 %1262  ;;  %v1479_v1 = vsel %vm1451_vm11, %v1446_v44, %v1193_v62 }
 0x1c2   : > { %v1512_v11 = vsel %vm1484_vm12, %v1479_v1, %v1228_v35 }
 0x1c3   : > { %v1833_v48 = vadd.f32 %v1832_v4, %v1802_v43  ;;  %v1545_v3 = vsel %vm1517_vm13, %v1512_v11, %v1263_v61 }
 0x1c7   : > { %v3474_v0 = vpop.f32.mrf.mxu1  ;;  %v1189_v8 = vpop.permute.xlu2 %1188 }
 0x1c8   : > { %1738 = vst [vmem:[%s3442_s6 + $0x48] sm:$0xff] %v3474_v0  ;;  %v1257_v6 = vpop.permute.xlu0 %1256 }
 0x1c9   : > { %v1539_v42 = vsel %vm1517_vm13, %v1506_v50, %v1257_v6  ;;  %v1111_v29 = vpop.permute.xlu1 %1110  ;;  %v1351_v50 = vsel %vm1303_vm6, %v3273_v18, %v3096_v23 }
 0x1ca   : > { %v1572_v58 = vsel %vm1550_vm14, %v1539_v42, %v1292_v51  ;;  %v1401_v26 = vsel %vm1385_vm9, %v3072_v53, %v1111_v29 }
 0x1cb   : > { %2148 = vmatmul.msk.bf16.gmra.mxu2 %vm1603_vm15, %v1572_v58  ;;  %v1434_v33 = vsel %vm1418_vm10, %v1401_v26, %v1146_v2 }
 0x1cf   : > { %v1230_v9 = vpop.permute.xlu2 %1229 }
 0x1d0   : > { %v1298_v30 = vpop.permute.xlu0 %1297 }
 0x1d1   : > { %v1578_v41 = vsel %vm1550_vm14, %v1545_v3, %v1298_v30  ;;  %v1216_v47 = vpop.permute.xlu1 %1215 }
 0x1d2   : > { %2151 = vmatmul.msk.bf16.gmra.mxu3 %vm1603_vm15, %v1578_v41 }
 0x1d5   : > { %v3490_v12 = vpop.f32.mrf.mxu2 }
 0x1d6   : > { %1745 = vst [vmem:[%s3442_s6 + $0x80] sm:$0xff] %v3490_v12 }
 0x1d7   : > { %v1294_v4 = vpop.permute.xlu2 %1293 }
 0x1d8   : > { %v1181_v10 = vpop.permute.xlu0 %1180 }
 0x1d9   : > { %v1119_v60 = vpop.permute.xlu1 %1118  ;;  %v1467_v36 = vsel %vm1451_vm11, %v1434_v33, %v1181_v10 }
 0x1da   : > { %v1500_v7 = vsel %vm1484_vm12, %v1467_v36, %v1216_v47  ;;  %v1409_v16 = vsel %vm1385_vm9, %v3184_v39, %v1119_v60 }
 0x1db   : > { %v1533_v53 = vsel %vm1517_vm13, %v1500_v7, %v1251_v59 }
 0x1dd   : > { %v3499_v40 = vpop.f32.mrf.mxu2 }
 0x1de   : > { %1746 = vst [vmem:[%s3442_s6 + $0x88] sm:$0xff] %v3499_v40 }
 0x1e0   : > { %v1286_v25 = vpop.permute.xlu0 %1285 }
 0x1e1   : > { %v1566_v37 = vsel %vm1550_vm14, %v1533_v53, %v1286_v25  ;;  %v1160_v20 = vpop.permute.xlu1 %1159 }
 0x1e2   : > { %2145 = vmatmul.msk.bf16.gmra.mxu1 %vm1603_vm15, %v1566_v37  ;;  %v1807_v37 = vmul.f32 %v3465_v14, %v3465_v14 }
 0x1e8   : > { %v1659_v15 = vpop.f32.mrf.mxu0  ;;  %v1154_v13 = vpop.permute.xlu0 %1153 }
 0x1e9   : > { %1733 = vst [vmem:[%s3442_s6 + $0x20] sm:$0xff] %v1659_v15  ;;  %v1764_v5 = vadd.f32 %v1763_v49, %v1659_v15  ;;  %v1803_v24 = vmul.f32 %v1659_v15, %v1659_v15  ;;  %v1224_v57 = vpop.permute.xlu1 %1223  ;;  %v1442_v52 = vsel %vm1418_vm10, %v1409_v16, %v1154_v13  ;;  %v1415_v49 = vsel %vm1385_vm9, %v3198_v17, %v1125_v19  ;;  %v1127_v17 = vpop.permute.xlu2 %1126 }
 0x1ea   : > { %v1475_v21 = vsel %vm1451_vm11, %v1442_v52, %v1189_v8  ;;  %v1448_v43 = vsel %vm1418_vm10, %v1415_v49, %v1160_v20  ;;  %v1808_v15 = vmul.f32 %v3474_v0, %v3474_v0 }
 0x1eb   : > { %v1834_v27 = vadd.f32 %v1833_v48, %v1803_v24  ;;  %v1508_v51 = vsel %vm1484_vm12, %v1475_v21, %v1224_v57 }
 0x1ef   : > { %v3507_v38 = vpop.f32.mrf.mxu1 }
 0x1f0   : > { %1739 = vst [vmem:[%s3442_s6 + $0x50] sm:$0xff] %v3507_v38  ;;  %v1661_v28 = vpop.f32.mrf.mxu0  ;;  %v1195_v63 = vpop.permute.xlu0 %1194  ;;  %v1809_v24 = vmul.f32 %v3507_v38, %v3507_v38 }
 0x1f1   : > { %1734 = vst [vmem:[%s3442_s6 + $0x28] sm:$0xff] %v1661_v28  ;;  %v1765_v46 = vadd.f32 %v1764_v5, %v1661_v28  ;;  %v1804_v56 = vmul.f32 %v1661_v28, %v1661_v28  ;;  %v1265_v35 = vpop.permute.xlu1 %1264  ;;  %v1481_v34 = vsel %vm1451_vm11, %v1448_v43, %v1195_v63  ;;  %v1232_v1 = vpop.permute.xlu2 %1231 }
 0x1f2   : > { %v1514_v48 = vsel %vm1484_vm12, %v1481_v34, %v1230_v9 }
 0x1f3   : > { %v1835_v22 = vadd.f32 %v1834_v27, %v1804_v56  ;;  %v1547_v55 = vsel %vm1517_vm13, %v1514_v48, %v1265_v35  ;;  %v1815_v48 = vmul.f32 %v3490_v12, %v3490_v12 }
 0x1f7   : > { %v3516_v32 = vpop.f32.mrf.mxu1 }
 0x1f8   : > { %1740 = vst [vmem:[%s3442_s6 + $0x58] sm:$0xff] %v3516_v32  ;;  %v1259_v31 = vpop.permute.xlu0 %1258 }
 0x1f9   : > { %v1541_v62 = vsel %vm1517_vm13, %v1508_v51, %v1259_v31  ;;  %v1092_v61 = vpop.permute.xlu1 %1091 }
 0x1fa   : > { %v1574_v39 = vsel %vm1550_vm14, %v1541_v62, %v1294_v4  ;;  %v1384_v42 = vsel %vm1352_vm7, %v1351_v50, %v1092_v61 }
 0x1fb   : > { %2149 = vmatmul.msk.bf16.gmra.mxu2 %vm1603_vm15, %v1574_v39  ;;  %v1417_v45 = vsel %vm1385_vm9, %v1384_v42, %v1127_v17 }
 0x200   : > { %v1300_v2 = vpop.permute.xlu0 %1299 }
 0x201   : > { %v1580_v54 = vsel %vm1550_vm14, %v1547_v55, %v1300_v2  ;;  %v1197_v6 = vpop.permute.xlu1 %1196 }
 0x202   : > { %2152 = vmatmul.msk.bf16.gmra.mxu3 %vm1603_vm15, %v1580_v54  ;;  %v1816_v54 = vmul.f32 %v3499_v40, %v3499_v40 }
 0x208   : > { %v1162_v29 = vpop.permute.xlu0 %1161 }
 0x209   : > { %v1450_v58 = vsel %vm1418_vm10, %v1417_v45, %v1162_v29  ;;  %v1302_v23 = vpop.permute.xlu1 %1301 }
 0x20a   : > { %v1483_v44 = vsel %vm1451_vm11, %v1450_v58, %v1197_v6 }
 0x20b   : > { %v1516_v18 = vsel %vm1484_vm12, %v1483_v44, %v1232_v1 }
 0x20e   : > { %v3539_v11 = vpop.f32.mrf.mxu2 }
 0x20f   : > { %1747 = vst [vmem:[%s3442_s6 + $0x90] sm:$0xff] %v3539_v11  ;;  %v1817_v6 = vmul.f32 %v3539_v11, %v3539_v11 }
 0x210   : > { %v1267_v3 = vpop.permute.xlu0 %1266 }
 0x211   : > { %v1549_v30 = vsel %vm1517_vm13, %v1516_v18, %v1267_v3 }
 0x212   : > { %v1582_v59 = vsel %vm1550_vm14, %v1549_v30, %v1302_v23 }
 0x213   : > { %2153 = vmatmul.msk.bf16.gmra.mxu3 %vm1603_vm15, %v1582_v59 }
 0x215   : > { %v3547_v41 = vpop.f32.mrf.mxu3 }
 0x216   : > { %1753 = vst [vmem:[%s3442_s6 + $0xc0] sm:$0xff] %v3547_v41  ;;  %v3551_v47 = vpop.f32.mrf.mxu2 }
 0x217   : > { %1748 = vst [vmem:[%s3442_s6 + $0x98] sm:$0xff] %v3551_v47  ;;  %v1818_v45 = vmul.f32 %v3551_v47, %v3551_v47 }
 0x21d   : > { %v3555_v26 = vpop.f32.mrf.mxu3 }
 0x21e   : > { %1754 = vst [vmem:[%s3442_s6 + $0xc8] sm:$0xff] %v3555_v26 }
 0x228   : > { %v1664_v10 = vpop.f32.mrf.mxu0 }
 0x229   : > { %1735 = vst [vmem:[%s3442_s6 + $0x30] sm:$0xff] %v1664_v10  ;;  %v1766_v33 = vadd.f32 %v1765_v46, %v1664_v10  ;;  %v1805_v60 = vmul.f32 %v1664_v10, %v1664_v10 }
 0x22b   : > { %v1836_v36 = vadd.f32 %v1835_v22, %v1805_v60 }
 0x22f   : > { %v1679_v19 = vpop.f32.mrf.mxu1 }
 0x230   : > { %1741 = vst [vmem:[%s3442_s6 + $0x60] sm:$0xff] %v1679_v19  ;;  %v1666_v7 = vpop.f32.mrf.mxu0 }
 0x231   : > { %1736 = vst [vmem:[%s3442_s6 + $0x38] sm:$0xff] %v1666_v7  ;;  %v1767_v25 = vadd.f32 %v1766_v33, %v1666_v7  ;;  %v1806_v53 = vmul.f32 %v1666_v7, %v1666_v7 }
 0x233   : > { %v1768_v20 = vadd.f32 %v1767_v25, %v3465_v14  ;;  %v1837_v8 = vadd.f32 %v1836_v36, %v1806_v53  ;;  %v1810_v14 = vmul.f32 %v3516_v32, %v3516_v32  ;;  %v1824_v53 = vmul.f32 %v3555_v26, %v3555_v26 }
 0x235   : > { %v1769_v13 = vadd.f32 %v1768_v20, %v3474_v0  ;;  %v1838_v5 = vadd.f32 %v1837_v8, %v1807_v37  ;;  %v1811_v0 = vmul.f32 %v1679_v19, %v1679_v19 }
 0x237   : > { %v1770_v57 = vadd.f32 %v1769_v13, %v3507_v38  ;;  %v1839_v27 = vadd.f32 %v1838_v5, %v1808_v15  ;;  %v1681_v9 = vpop.f32.mrf.mxu1 }
 0x238   : > { %1742 = vst [vmem:[%s3442_s6 + $0x68] sm:$0xff] %v1681_v9  ;;  %v1812_v16 = vmul.f32 %v1681_v9, %v1681_v9 }
 0x239   : > { %v1840_v28 = vadd.f32 %v1839_v27, %v1809_v24  ;;  %v1771_v63 = vadd.f32 %v1770_v57, %v3516_v32 }
 0x23b   : > { %v1772_v46 = vadd.f32 %v1771_v63, %v1679_v19  ;;  %v1841_v56 = vadd.f32 %v1840_v28, %v1810_v14  ;;  %v1823_v19 = vmul.f32 %v3547_v41, %v3547_v41 }
 0x23d   : > { %v1773_v35 = vadd.f32 %v1772_v46, %v1681_v9  ;;  %v1842_v38 = vadd.f32 %v1841_v56, %v1811_v0 }
 0x23f   : > { %v1843_v22 = vadd.f32 %v1842_v38, %v1812_v16 }
 0x24e   : > { %v1699_v52 = vpop.f32.mrf.mxu2 }
 0x24f   : > { %1749 = vst [vmem:[%s3442_s6 + $0xa0] sm:$0xff] %v1699_v52  ;;  %v1819_v1 = vmul.f32 %v1699_v52, %v1699_v52 }
 0x255   : > { %v1714_v21 = vpop.f32.mrf.mxu3 }
 0x256   : > { %1755 = vst [vmem:[%s3442_s6 + $0xd0] sm:$0xff] %v1714_v21  ;;  %v1701_v4 = vpop.f32.mrf.mxu2  ;;  %v1825_v13 = vmul.f32 %v1714_v21, %v1714_v21 }
 0x257   : > { %1750 = vst [vmem:[%s3442_s6 + $0xa8] sm:$0xff] %v1701_v4  ;;  %v1820_v18 = vmul.f32 %v1701_v4, %v1701_v4 }
 0x25d   : > { %v1716_v51 = vpop.f32.mrf.mxu3 }
 0x25e   : > { %1756 = vst [vmem:[%s3442_s6 + $0xd8] sm:$0xff] %v1716_v51  ;;  %v1826_v57 = vmul.f32 %v1716_v51, %v1716_v51 }
 0x25f   : > { %v1684_v31 = vpop.f32.mrf.mxu1 }
 0x260   : > { %1743 = vst [vmem:[%s3442_s6 + $0x70] sm:$0xff] %v1684_v31  ;;  %v1813_v32 = vmul.f32 %v1684_v31, %v1684_v31  ;;  %v1774_v49 = vadd.f32 %v1773_v35, %v1684_v31 }
 0x262   : > { %v1844_v43 = vadd.f32 %v1843_v22, %v1813_v32 }
 0x267   : > { %v1686_v62 = vpop.f32.mrf.mxu1 }
 0x268   : > { %1744 = vst [vmem:[%s3442_s6 + $0x78] sm:$0xff] %v1686_v62  ;;  %v1814_v39 = vmul.f32 %v1686_v62, %v1686_v62  ;;  %v1775_v61 = vadd.f32 %v1774_v49, %v1686_v62 }
 0x26a   : > { %v1845_v34 = vadd.f32 %v1844_v43, %v1814_v39  ;;  %v1776_v55 = vadd.f32 %v1775_v61, %v3490_v12 }
 0x26c   : > { %v1846_v2 = vadd.f32 %v1845_v34, %v1815_v48  ;;  %v1777_v17 = vadd.f32 %v1776_v55, %v3499_v40 }
 0x26e   : > { %v1847_v50 = vadd.f32 %v1846_v2, %v1816_v54  ;;  %v1778_v42 = vadd.f32 %v1777_v17, %v3539_v11 }
 0x270   : > { %v1848_v29 = vadd.f32 %v1847_v50, %v1817_v6  ;;  %v1779_v58 = vadd.f32 %v1778_v42, %v3551_v47 }
 0x272   : > { %v1849_v12 = vadd.f32 %v1848_v29, %v1818_v45  ;;  %v1780_v23 = vadd.f32 %v1779_v58, %v1699_v52 }
 0x274   : > { %v1850_v40 = vadd.f32 %v1849_v12, %v1819_v1  ;;  %v1781_v3 = vadd.f32 %v1780_v23, %v1701_v4 }
 0x276   : > { %v1851_v10 = vadd.f32 %v1850_v40, %v1820_v18 }
 0x27e   : > { %v1704_v44 = vpop.f32.mrf.mxu2 }
 0x27f   : > { %1751 = vst [vmem:[%s3442_s6 + $0xb0] sm:$0xff] %v1704_v44  ;;  %v1821_v30 = vmul.f32 %v1704_v44, %v1704_v44  ;;  %v1782_v59 = vadd.f32 %v1781_v3, %v1704_v44 }
 0x281   : > { %v1852_v60 = vadd.f32 %v1851_v10, %v1821_v30 }
 0x285   : > { %v1719_v11 = vpop.f32.mrf.mxu3 }
 0x286   : > { %1757 = vst [vmem:[%s3442_s6 + $0xe0] sm:$0xff] %v1719_v11  ;;  %v1706_v33 = vpop.f32.mrf.mxu2  ;;  %v1827_v14 = vmul.f32 %v1719_v11, %v1719_v11 }
 0x287   : > { %1752 = vst [vmem:[%s3442_s6 + $0xb8] sm:$0xff] %v1706_v33  ;;  %v1783_v36 = vadd.f32 %v1782_v59, %v1706_v33  ;;  %v1822_v47 = vmul.f32 %v1706_v33, %v1706_v33 }
 0x289   : > { %v1784_v7 = vadd.f32 %v1783_v36, %v3547_v41  ;;  %v1853_v25 = vadd.f32 %v1852_v60, %v1822_v47 }
 0x28b   : > { %v1785_v37 = vadd.f32 %v1784_v7, %v3555_v26  ;;  %v1854_v20 = vadd.f32 %v1853_v25, %v1823_v19 }
 0x28d   : > { %v1855_v8 = vadd.f32 %v1854_v20, %v1824_v53  ;;  %v1721_v15 = vpop.f32.mrf.mxu3  ;;  %v1786_v5 = vadd.f32 %v1785_v37, %v1714_v21 }
 0x28e   : > { %1758 = vst [vmem:[%s3442_s6 + $0xe8] sm:$0xff] %v1721_v15  ;;  %v1828_v0 = vmul.f32 %v1721_v15, %v1721_v15 }
 0x28f   : > { %v1856_v24 = vadd.f32 %v1855_v8, %v1825_v13  ;;  %v1787_v27 = vadd.f32 %v1786_v5, %v1716_v51 }
 0x291   : > { %v1857_v9 = vadd.f32 %v1856_v24, %v1826_v57  ;;  %v1788_v28 = vadd.f32 %v1787_v27, %v1719_v11 }
 0x293   : > { %v1858_v26 = vadd.f32 %v1857_v9, %v1827_v14  ;;  %v1789_v63 = vadd.f32 %v1788_v28, %v1721_v15 }
 0x295   : > { %v1859_v56 = vadd.f32 %v1858_v26, %v1828_v0 }
 0x296   : > { %v1724_v41 = vpop.f32.mrf.mxu3 }
 0x297   : > { %1759 = vst [vmem:[%s3442_s6 + $0xf0] sm:$0xff] %v1724_v41  ;;  %v1829_v46 = vmul.f32 %v1724_v41, %v1724_v41  ;;  %v1790_v35 = vadd.f32 %v1789_v63, %v1724_v41 }
 0x299   : > { %v1860_v38 = vadd.f32 %v1859_v56, %v1829_v46 }
 0x29e   : > { %v1726_v16 = vpop.f32.mrf.mxu3 }
 0x29f   : > { %1760 = vst [vmem:[%s3442_s6 + $0xf8] sm:$0xff] %v1726_v16  ;;  %v1791_v22 = vadd.f32 %v1790_v35, %v1726_v16  ;;  %v1830_v52 = vmul.f32 %v1726_v16, %v1726_v16 }
 0x2a0   : > { %2275 = shalt.err (!%p2272_p3)
}
 0x2a1   : > { %s2380_s6 = smov 128   ;;  %v1792_v21 = vrot.slane %v1791_v22, 4  ;;  %v1861_v4 = vadd.f32 %v1860_v38, %v1830_v52  ;;  %s1904_s11 = scalar_lea.hbm %s3693_s3, %s2427_s19 }
 0x2a2   : > { %2190 = dma.vmem_to_hbm [thread:$0]  (%p2446_p5), %s1891_s12, 4096, %s1893_s13, %s1870_s14, %s2380_s6, %s2380_s6, %s2373_s7  }
 0x2a3   : > { %v1793_v51 = vadd.f32 %v1792_v21, %v1791_v22  ;;  %v1862_v31 = vrot.slane %v1861_v4, 4  ;;  %s1874_s22 = sand.u32 1, %s2427_s19   ;;  %s1917_s28 = scalar_lea.hbm %s3694_s4, %s2427_s19 }
 0x2a4   : > { %s200_s29 = scalar_lea.vmem [#allocation4], %s3438_s30  ;;  %s3634_s12 = sshll.u32 %s1904_s11, 4  ;;  %s1909_s12 = int_to_ptr.hbm [resolvable:$true] %s3634_s12 }
 0x2a5   : > { %v1794_v32 = vrot.slane %v1793_v51, 2  ;;  %v1863_v62 = vadd.f32 %v1862_v31, %v1861_v4  ;;  %s3632_s7 = sshll.u32 %s200_s29, 4  ;;  %s206_s13 = scalar_lea.vmem [#allocation6], %s3438_s30  ;;  %s1907_s7 = int_to_ptr.vmem [resolvable:$true] %s3632_s7 }
 0x2a6   : > { %s3637_s14 = sshll.u32 %s206_s13, 4  ;;  %s3639_s5 = sshll.u32 %s1917_s28, 4  ;;  %s1920_s14 = int_to_ptr.vmem [resolvable:$true] %s3637_s14  ;;  %s1922_s5 = int_to_ptr.hbm [resolvable:$true] %s3639_s5 }
 0x2a7   : > { %v1795_v49 = vadd.f32 %v1794_v32, %v1793_v51  ;;  %v1864_v39 = vrot.slane %v1863_v62, 2  ;;  %s1875_s19 = scalar_lea.sflag [#allocation5], %s1874_s22  ;;  %s2290_s8 = sshra.s32 %s1909_s12, 4  ;;  %s2291_s8 = int_to_ptr.hbm [resolvable:$true] %s2290_s8 }
 0x2a8   : > { %s2292_s6 = scalar_lea.hbm %s2291_s8, 1  ;;  %s2296_s10 = scalar_lea.hbm %s3693_s3, 2 }
 0x2a9   : > { %v1865_v43 = vadd.f32 %v1864_v39, %v1863_v62  ;;  %v1796_v61 = vrot.slane %v1795_v49, 1  ;;  %p2293_p4 = scmp.ne.s32.totalorder %s2291_s8, %s2292_s6  ;;  %p2297_p9 = scmp.lt.s32.totalorder %s2291_s8, %s3693_s3 }
 0x2aa   : > { %p2298_p10 = scmp.lt.s32.totalorder %s2296_s10, %s2292_s6 }
 0x2ab   : > { %v1797_v34 = vadd.f32 %v1796_v61, %v1795_v49  ;;  %v1866_v48 = vrot.slane %v1865_v43, 1  ;;  %p2294_p7 = pnand %p2293_p4, %p2446_p5 }
 0x2ac   : > { %p2299_p11 = por %p2298_p10, %p2297_p9 }
 0x2ad   : > { %1798 = vst [vmem:[%s200_s29] sm:$0x1] %v1797_v34  ;;  %v1867_v55 = vadd.f32 %v1866_v48, %v1865_v43  ;;  %p2295_p8 = pneg %p2294_p7 }
 0x2af   : > { %p2300_p12 = pnand %p2299_p11, %p2295_p8 }
 0x2b1   : > { %2303 = shalt.err (!%p2300_p12)
}
 0x2b2   : > { %2191 = dma.vmem_to_hbm [thread:$0]  (%p2446_p5), %s1907_s7, 16, %s1909_s12, %s1875_s19   ;;  %1868 = vst [vmem:[%s206_s13] sm:$0x1] %v1867_v55 }
 0x2b3   : > { %s2318_s22 = sshra.s32 %s1922_s5, 4  ;;  %s2324_s8 = scalar_lea.hbm %s3694_s4, 2  ;;  %s2319_s22 = int_to_ptr.hbm [resolvable:$true] %s2318_s22 }
 0x2b4   : > { %s2320_s27 = scalar_lea.hbm %s2319_s22, 1  ;;  %p2325_p2 = scmp.lt.s32.totalorder %s2319_s22, %s3694_s4 }
 0x2b5   : > { %p2321_p13 = scmp.ne.s32.totalorder %s2319_s22, %s2320_s27  ;;  %p2326_p3 = scmp.lt.s32.totalorder %s2324_s8, %s2320_s27 }
 0x2b7   : > { %p2322_p0 = pnand %p2321_p13, %p2446_p5  ;;  %p2327_p4 = por %p2326_p3, %p2325_p2 }
 0x2b9   : > { %p2323_p1 = pneg %p2322_p0 }
 0x2bb   : > { %p2328_p7 = pnand %p2327_p4, %p2323_p1 }
 0x2bd   : > { %2331 = shalt.err (!%p2328_p7)
}
 0x2be   : > { %2192 = dma.vmem_to_hbm [thread:$0]  (%p2446_p5), %s1920_s14, 16, %s1922_s5, %s1875_s19  }
 0x2bf PF: > { %p2206_p8 = scmp.ge.s32.totalorder %s2370_s18, 2  ;;  %s1933_s7 = sand.u32 1, %s2358_s15  }
 0x2c0   : > { %s1934_s12 = scalar_lea.sflag [#allocation3], %s1933_s7 }
 0x2c1   : > { %p2197_p9 = pnand %p2206_p8, %p2450_p6 }
 0x2c3   : > { %p2198_p10 = pneg %p2197_p9 }
 0x2c5   : > { %2349 = dma.done.wait (%p2198_p10), %s1934_s12, 4096  }
 0x2c6   : > { %2351 = vsyncadd (%p2198_p10), %s1934_s12, 4294963200  ;;  %s1943_s25 = sand.u32 1, %s2034_s20  }
 0x2c7   : > { %s1944_s13 = scalar_lea.sflag [#allocation5], %s1943_s25 }
 0x2c8   : > { %2353 = dma.done.wait (%p2198_p10), %s1944_s13, 32  }
 0x2c9   : > { %2355 = vsyncadd (%p2198_p10), %s1944_s13, 4294967264  ;;  %p18_p5 = scmp.ge.s32.totalorder %s2431_s21, 4   ;;  %s3756_s15 = smov %s2362_s16 }
 0x2ca   : > { %s3757_s16 = smov %s2366_s17  ;;  %s3758_s17 = smov %s2444_s24 }
 0x2cb   : > { %s3759_s18 = smov %s2431_s21  ;;  %20 = sbr.rel (!%p18_p5) target bundleno = 5 (0x5), region = 95 }
 0x2d0   :  { %1958 = vsyncpa [#allocation3], 1 }
 0x2d1   :  { %1960 = vsyncpa [#allocation3 + $0x1], 1 }
 0x2d2   :  { %1961 = vsyncpa [#allocation5], 1 }
 0x2d3   :  { %1963 = vsyncpa [#allocation5 + $0x1], 1 }

</bundles_post_ra>
